<compile_context>
chip_gen: v7x
topology: tpu7x:2x2x1
jax: 0.10.0
libtpu: 0.0.40
codegen_flags: <defaults>
</compile_context>

<pallas_src>
import math

import jax
import jax.numpy as jnp
from jax import lax
from jax.experimental import pallas as pl
from jax.experimental.pallas import tpu as pltpu

_SQRT2_INV = 0.7071067811865476


def _layernorm(x, g, b, eps=1e-5):
    mu = jnp.mean(x, axis=-1, keepdims=True)
    var = jnp.mean((x - mu) ** 2, axis=-1, keepdims=True)
    return (x - mu) * lax.rsqrt(var + eps) * g + b


def _gelu(x):
    # exact (erf-based) GELU, matching PyTorch nn.GELU() default
    return 0.5 * x * (1.0 + lax.erf(x * _SQRT2_INV))


# ---------------------------------------------------------------------------
# Fused kernel: patch-embed prologue + `depth` mixer blocks + head epilogue
# ---------------------------------------------------------------------------
def _make_mixer_kernel(Bb, N, K, D, cm_chunk):
    n_cm_chunks = Bb // cm_chunk

    def kernel(
        patches_ref, w_emb_ref, b_emb_ref,
        ln1g_ref, ln1b_ref, w1t_ref, b1t_ref, w2t_ref, b2t_ref,
        ln2g_ref, ln2b_ref, w1c_ref, b1c_ref, w2c_ref, b2c_ref,
        lng_ref, lnb_ref, wh_ref, bh_ref,
        o_ref,
        x_acc,
    ):
        d = pl.program_id(1)
        last = pl.num_programs(1) - 1

        # ---- patch embedding prologue: one folded (Bb*N, K) @ (K, D) -------
        @pl.when(d == 0)
        def _patch_embed():
            p = patches_ref[...].reshape(Bb * N, K)                 # bf16
            emb = jnp.dot(p, w_emb_ref[...],
                          preferred_element_type=jnp.float32)       # (Bb*N, D)
            x_acc[...] = (emb + b_emb_ref[...]).reshape(Bb, N, D)

        # ---- token mixing: LN -> (T,N)@(N,D) -> GELU -> (N,T)@(T,D) --------
        ln1g = ln1g_ref[...]
        ln1b = ln1b_ref[...]
        w1t = w1t_ref[...]                                          # (T, N) bf16
        b1t = b1t_ref[...]                                          # (T, 1) f32
        w2t = w2t_ref[...]                                          # (N, T) bf16
        b2t = b2t_ref[...]                                          # (N, 1) f32

        def tok_body(i, carry):
            xi = x_acc[i]                                           # (N, D) f32
            yi = _layernorm(xi, ln1g, ln1b).astype(jnp.bfloat16)
            h = jnp.dot(w1t, yi, preferred_element_type=jnp.float32)   # (T, D)
            h = _gelu(h + b1t).astype(jnp.bfloat16)
            tok = jnp.dot(w2t, h, preferred_element_type=jnp.float32)  # (N, D)
            x_acc[i] = xi + tok + b2t
            return carry

        lax.fori_loop(0, Bb, tok_body, 0)

        # ---- channel mixing (image-chunked fold): LN -> (rows,D)@(D,C) -----
        ln2g = ln2g_ref[...]
        ln2b = ln2b_ref[...]
        w1c = w1c_ref[...]                                          # (D, C) bf16
        b1c = b1c_ref[...]                                          # (1, C)
        w2c = w2c_ref[...]                                          # (C, D) bf16
        b2c = b2c_ref[...]                                          # (1, D)

        def ch_body(ci, carry):
            s = ci * cm_chunk
            xi = x_acc[pl.ds(s, cm_chunk)]                          # (cm, N, D)
            yi = _layernorm(xi, ln2g, ln2b)
            y2 = yi.reshape(cm_chunk * N, D).astype(jnp.bfloat16)
            hc = jnp.dot(y2, w1c, preferred_element_type=jnp.float32) + b1c
            hc = _gelu(hc).astype(jnp.bfloat16)
            ch = jnp.dot(hc, w2c, preferred_element_type=jnp.float32) + b2c
            x_acc[pl.ds(s, cm_chunk)] = xi + ch.reshape(cm_chunk, N, D)
            return carry

        lax.fori_loop(0, n_cm_chunks, ch_body, 0)

        # ---- classifier head epilogue: batched (Bb, D) @ (D, cpad) ---------
        @pl.when(d == last)
        def _head():
            yh = _layernorm(x_acc[...], lng_ref[...], lnb_ref[...])  # (Bb, N, D)
            m = jnp.mean(yh, axis=1)                                 # (Bb, D)
            o_ref[...] = (
                jnp.dot(m.astype(jnp.bfloat16), wh_ref[...],
                        preferred_element_type=jnp.float32)
                + bh_ref[...]
            )                                                        # (Bb, cpad)

    return kernel


# ---------------------------------------------------------------------------
# Wrapper / pallas_call plumbing
# ---------------------------------------------------------------------------
def _round_up(x, m):
    return ((x + m - 1) // m) * m


def extract_patches(x, patch):
    # NCHW -> (B, num_patches, C*patch*patch); patch vector ordered (c, kh, kw)
    # to match Conv2d(weight (dim, C, P, P)) flattening.  Pure layout glue.
    B, C, H, W = x.shape
    Hp, Wp = H // patch, W // patch
    p = x.reshape(B, C, Hp, patch, Wp, patch)
    p = p.transpose(0, 2, 4, 1, 3, 5)              # (B, Hp, Wp, C, P, P)
    return p.reshape(B, Hp * Wp, C * patch * patch)


def _choose_cm_chunk(Bb, N, C, D, budget_bytes=8 << 20):
    # Largest divisor of Bb whose channel-mix temporaries (f32 + bf16 hidden,
    # LN copies, output) stay under the budget.
    best = 1
    for c in range(1, Bb + 1):
        if Bb % c:
            continue
        if c * N * (6 * C + 16 * D) <= budget_bytes:
            best = c
    return best


def _vmem_estimate(Bb, cm_chunk, N, K, D, T, C, cpad, pd_bytes, cn_bytes):
    io = 2 * (Bb * N * K * 2) + 2 * (Bb * cpad * 4)      # double-buffered in/out blocks
    acc = Bb * N * D * 4                                 # resident residual stream
    act = (cm_chunk * N * (6 * C + 16 * D)               # channel-mix temporaries
           + N * D * 12 + T * D * 8                      # per-image token-mix temporaries
           + 2 * Bb * N * D * 4)                         # head / prologue temporaries
    return 2 * pd_bytes + 2 * cn_bytes + io + acc + act + (4 << 20)


def _choose_batch_block(B, N, K, D, T, C, cpad, pd_bytes, cn_bytes, vmem_cap,
                        max_bb=16):
    # Largest divisor of B that fits the VMEM budget.  No forced ">=2 tiles":
    # on single-TC parts (v5e/v6e) more tiles is pure loop overhead; on v7x
    # the "parallel" batch axis shards across 2 cores when tiles > 1.
    budget = int(vmem_cap * 0.7)
    best = 1
    for bb in range(1, min(B, max_bb) + 1):
        if B % bb:
            continue
        cm = _choose_cm_chunk(bb, N, C, D)
        if _vmem_estimate(bb, cm, N, K, D, T, C, cpad, pd_bytes, cn_bytes) <= budget:
            best = bb
    return best


def mlp_mixer_forward(img, params, patch_size, batch_block=None):
    # Patches go to HBM/VMEM in bf16 (half the DMA; matmul is bf16 anyway).
    patches = extract_patches(img, patch_size).astype(jnp.bfloat16)   # (B, N, K)
    B, N, K = patches.shape
    D = params["w_emb"].shape[1]
    depth, T = params["w1_tok"].shape[0], params["w1_tok"].shape[1]
    C = params["w1_ch"].shape[2]
    cpad = params["w_head"].shape[1]
    ncls = params["num_classes"]

    pd_keys = ["ln1_g", "ln1_b", "w1_tok", "b1_tok", "w2_tok", "b2_tok",
               "ln2_g", "ln2_b", "w1_ch", "b1_ch", "w2_ch", "b2_ch"]
    cn_keys = ["w_emb", "b_emb", "ln_g", "ln_b", "w_head", "b_head"]
    pd_bytes = sum(math.prod(params[k].shape[1:]) * params[k].dtype.itemsize
                   for k in pd_keys)
    cn_bytes = sum(math.prod(params[k].shape) * params[k].dtype.itemsize
                   for k in cn_keys)

    try:  # generation-aware VMEM budget (64 MiB on v7x, 128 MiB on v5e/v6e)
        vmem_cap = int(pltpu.get_tpu_info().vmem_capacity_bytes)
    except Exception:
        vmem_cap = 64 << 20

    Bb = (batch_block if batch_block is not None else
          _choose_batch_block(B, N, K, D, T, C, cpad, pd_bytes, cn_bytes, vmem_cap))
    assert B % Bb == 0
    cm_chunk = _choose_cm_chunk(Bb, N, C, D)

    est = _vmem_estimate(Bb, cm_chunk, N, K, D, T, C, cpad, pd_bytes, cn_bytes)
    vmem_bytes = int(min(max(est, 32 << 20), int(vmem_cap * 0.85)))

    grid = (B // Bb, depth)

    def const_spec(shape):
        nd = len(shape)
        return pl.BlockSpec(shape, lambda b, d, _n=nd: (0,) * _n)

    def depth_spec(arr):
        # leading `depth` axis squeezed away; block index follows grid axis 1
        return pl.BlockSpec((None,) + tuple(arr.shape[1:]), lambda b, d: (d, 0, 0))

    in_specs = [
        pl.BlockSpec((Bb, N, K), lambda b, d: (b, 0, 0)),          # patches (bf16)
        const_spec((K, D)), const_spec((1, D)),                    # patch embed
        depth_spec(params["ln1_g"]), depth_spec(params["ln1_b"]),
        depth_spec(params["w1_tok"]), depth_spec(params["b1_tok"]),
        depth_spec(params["w2_tok"]), depth_spec(params["b2_tok"]),
        depth_spec(params["ln2_g"]), depth_spec(params["ln2_b"]),
        depth_spec(params["w1_ch"]), depth_spec(params["b1_ch"]),
        depth_spec(params["w2_ch"]), depth_spec(params["b2_ch"]),
        const_spec((1, D)), const_spec((1, D)),                    # head LN
        const_spec((D, cpad)), const_spec((1, cpad)),              # head Linear (padded)
    ]

    kernel = _make_mixer_kernel(Bb, N, K, D, cm_chunk)

    out = pl.pallas_call(
        kernel,
        out_shape=jax.ShapeDtypeStruct((B, cpad), jnp.float32),
        grid=grid,
        in_specs=in_specs,
        out_specs=pl.BlockSpec((Bb, cpad), lambda b, d: (b, 0)),
        scratch_shapes=[pltpu.VMEM((Bb, N, D), jnp.float32)],
        compiler_params=pltpu.CompilerParams(
            dimension_semantics=("parallel", "arbitrary"),
            vmem_limit_bytes=vmem_bytes,
        ),
    )(
        patches,
        params["w_emb"], params["b_emb"],
        params["ln1_g"], params["ln1_b"],
        params["w1_tok"], params["b1_tok"], params["w2_tok"], params["b2_tok"],
        params["ln2_g"], params["ln2_b"],
        params["w1_ch"], params["b1_ch"], params["w2_ch"], params["b2_ch"],
        params["ln_g"], params["ln_b"], params["w_head"], params["b_head"],
    )
    return out[:, :ncls]                                            # strip lane padding


# ---------------------------------------------------------------------------
# Pure-JAX reference (same weights) for a sanity check
# ---------------------------------------------------------------------------
def mlp_mixer_reference(img, params, patch_size):
    x = extract_patches(img, patch_size)
    x = x @ params["w_emb"].astype(jnp.float32) + params["b_emb"]
    depth = params["w1_tok"].shape[0]
    for l in range(depth):
        y = _layernorm(x, params["ln1_g"][l], params["ln1_b"][l])
        w1 = params["w1_tok"][l].astype(jnp.float32)   # (T, N)
        w2 = params["w2_tok"][l].astype(jnp.float32)   # (N, T)
        h = _gelu(jnp.einsum("tn,bnd->btd", w1, y) + params["b1_tok"][l][None])
        x = x + jnp.einsum("nt,btd->bnd", w2, h) + params["b2_tok"][l][None]
        y2 = _layernorm(x, params["ln2_g"][l], params["ln2_b"][l])
        hc = _gelu(y2 @ params["w1_ch"][l].astype(jnp.float32) + params["b1_ch"][l])
        x = x + hc @ params["w2_ch"][l].astype(jnp.float32) + params["b2_ch"][l]
    y = _layernorm(x, params["ln_g"], params["ln_b"])
    m = jnp.mean(y, axis=1)
    logits = m @ params["w_head"].astype(jnp.float32) + params["b_head"]
    return logits[:, : params["num_classes"]]


# ---------------------------------------------------------------------------
# Parameter construction (weights bf16, biases/LN/accumulation f32)
# ---------------------------------------------------------------------------
def init_params(key, *, in_channels, dim, num_classes, patch_size, image_size,
                depth, token_dim, channel_dim):
    num_patch = (image_size // patch_size) ** 2
    K = in_channels * patch_size * patch_size
    cpad = _round_up(num_classes, 128)

    keys = jax.random.split(key, 5)

    def nrm(kk, shape, scale=0.02):
        return scale * jax.random.normal(kk, shape, dtype=jnp.float32)

    kb = jax.random.split(keys[0], 8 * depth)

    def stack_shape(idx, shape):
        return jnp.stack([nrm(kb[8 * i + idx], shape) for i in range(depth)], 0)

    w_head = nrm(keys[3], (dim, num_classes))
    b_head = nrm(keys[4], (1, num_classes))

    return dict(
        # patch embedding (== Conv2d(in_channels, dim, P, P) as a matmul)
        w_emb=nrm(keys[1], (K, dim)).astype(jnp.bfloat16),
        b_emb=nrm(keys[2], (1, dim)),
        # per-block params stacked along a leading `depth` axis.
        # Token-mix weights kept in native nn.Linear layout: (T, N) / (N, T).
        ln1_g=jnp.ones((depth, 1, dim), jnp.float32),
        ln1_b=jnp.zeros((depth, 1, dim), jnp.float32),
        w1_tok=stack_shape(0, (token_dim, num_patch)).astype(jnp.bfloat16),
        b1_tok=stack_shape(1, (token_dim, 1)),
        w2_tok=stack_shape(2, (num_patch, token_dim)).astype(jnp.bfloat16),
        b2_tok=stack_shape(3, (num_patch, 1)),
        ln2_g=jnp.ones((depth, 1, dim), jnp.float32),
        ln2_b=jnp.zeros((depth, 1, dim), jnp.float32),
        # channel-mix weights stored transposed ((D,C)/(C,D)) for canonical dots
        w1_ch=stack_shape(4, (dim, channel_dim)).astype(jnp.bfloat16),
        b1_ch=stack_shape(5, (1, channel_dim)),
        w2_ch=stack_shape(6, (channel_dim, dim)).astype(jnp.bfloat16),
        b2_ch=stack_shape(7, (1, dim)),
        # head (class dim padded to a lane-dense multiple of 128)
        ln_g=jnp.ones((1, dim), jnp.float32),
        ln_b=jnp.zeros((1, dim), jnp.float32),
        w_head=jnp.pad(w_head, ((0, 0), (0, cpad - num_classes))).astype(jnp.bfloat16),
        b_head=jnp.pad(b_head, ((0, 0), (0, cpad - num_classes))),
        num_classes=num_classes,
    )


if __name__ == "__main__":
    # small shapes consistent with the module's forward
    B, C_in, IMG = 2, 3, 16
    PATCH, DIM, DEPTH = 4, 32, 2
    TOKEN_DIM, CHANNEL_DIM, NUM_CLASSES = 16, 64, 8

    key = jax.random.PRNGKey(0)
    k_img, k_par = jax.random.split(key)
    img = jax.random.normal(k_img, (B, C_in, IMG, IMG), dtype=jnp.float32)

    params = init_params(
        k_par,
        in_channels=C_in, dim=DIM, num_classes=NUM_CLASSES,
        patch_size=PATCH, image_size=IMG, depth=DEPTH,
        token_dim=TOKEN_DIM, channel_dim=CHANNEL_DIM,
    )

    logits = mlp_mixer_forward(img, params, PATCH)
    logits = jax.block_until_ready(logits)
    assert logits.shape == (B, NUM_CLASSES)
    assert bool(jnp.all(jnp.isfinite(logits)))

    # loose sanity check vs. a pure-JAX reference (bf16 weights/activations in
    # the kernel -> small, expected deviation from an f32 forward)
    ref = jax.block_until_ready(mlp_mixer_reference(img, params, PATCH))
    max_err = float(jnp.max(jnp.abs(logits - ref)))
    assert max_err < 5e-2, f"mismatch vs reference: {max_err}"

    print("KERNEL_OK")
</pallas_src>

<mosaic_0001>
module attributes {stable_mosaic.version = 11 : i64} {
  func.func @kernel(%arg0: i32, %arg1: i32, %arg2: memref<2x16x48xbf16, #tpu.memory_space<vmem>>, %arg3: memref<48x32xbf16, #tpu.memory_space<vmem>>, %arg4: memref<1x32xf32, #tpu.memory_space<vmem>>, %arg5: memref<1x1x32xf32, #tpu.memory_space<vmem>>, %arg6: memref<1x1x32xf32, #tpu.memory_space<vmem>>, %arg7: memref<1x16x16xbf16, #tpu.memory_space<vmem>>, %arg8: memref<1x16x1xf32, #tpu.memory_space<vmem>>, %arg9: memref<1x16x16xbf16, #tpu.memory_space<vmem>>, %arg10: memref<1x16x1xf32, #tpu.memory_space<vmem>>, %arg11: memref<1x1x32xf32, #tpu.memory_space<vmem>>, %arg12: memref<1x1x32xf32, #tpu.memory_space<vmem>>, %arg13: memref<1x32x64xbf16, #tpu.memory_space<vmem>>, %arg14: memref<1x1x64xf32, #tpu.memory_space<vmem>>, %arg15: memref<1x64x32xbf16, #tpu.memory_space<vmem>>, %arg16: memref<1x1x32xf32, #tpu.memory_space<vmem>>, %arg17: memref<1x32xf32, #tpu.memory_space<vmem>>, %arg18: memref<1x32xf32, #tpu.memory_space<vmem>>, %arg19: memref<32x128xbf16, #tpu.memory_space<vmem>>, %arg20: memref<1x128xf32, #tpu.memory_space<vmem>>, %arg21: memref<2x128xf32, #tpu.memory_space<vmem>>, %arg22: memref<2x16x32xf32, #tpu.memory_space<vmem>>) attributes {dimension_semantics = [#tpu.dimension_semantics<parallel>, #tpu.dimension_semantics<arbitrary>], iteration_bounds = array<i64: 1, 2>, scalar_prefetch = 0 : i64, scratch_operands = 1 : i64, tpu.core_type = #tpu.core_type<tc>, window_params = [{transform_indices = @transform_0, window_bounds = array<i64: 2, 16, 48>}, {pipeline_mode = #tpu.pipeline_mode<synchronous>, transform_indices = @transform_1, window_bounds = array<i64: 48, 32>}, {pipeline_mode = #tpu.pipeline_mode<synchronous>, transform_indices = @transform_2, window_bounds = array<i64: 1, 32>}, {transform_indices = @transform_3, window_bounds = array<i64: 1, 1, 32>}, {transform_indices = @transform_4, window_bounds = array<i64: 1, 1, 32>}, {transform_indices = @transform_5, window_bounds = array<i64: 1, 16, 16>}, {transform_indices = @transform_6, window_bounds = array<i64: 1, 16, 1>}, {transform_indices = @transform_7, window_bounds = array<i64: 1, 16, 16>}, {transform_indices = @transform_8, window_bounds = array<i64: 1, 16, 1>}, {transform_indices = @transform_9, window_bounds = array<i64: 1, 1, 32>}, {transform_indices = @transform_10, window_bounds = array<i64: 1, 1, 32>}, {transform_indices = @transform_11, window_bounds = array<i64: 1, 32, 64>}, {transform_indices = @transform_12, window_bounds = array<i64: 1, 1, 64>}, {transform_indices = @transform_13, window_bounds = array<i64: 1, 64, 32>}, {transform_indices = @transform_14, window_bounds = array<i64: 1, 1, 32>}, {pipeline_mode = #tpu.pipeline_mode<synchronous>, transform_indices = @transform_15, window_bounds = array<i64: 1, 32>}, {pipeline_mode = #tpu.pipeline_mode<synchronous>, transform_indices = @transform_16, window_bounds = array<i64: 1, 32>}, {pipeline_mode = #tpu.pipeline_mode<synchronous>, transform_indices = @transform_17, window_bounds = array<i64: 32, 128>}, {pipeline_mode = #tpu.pipeline_mode<synchronous>, transform_indices = @transform_18, window_bounds = array<i64: 1, 128>}, {transform_indices = @transform_19, window_bounds = array<i64: 2, 128>}]} {
    %c0_i32 = arith.constant 0 : i32
    %0 = arith.cmpi eq, %arg1, %c0_i32 : i32
    %1 = arith.extui %0 : i1 to i32
    %c0_i32_0 = arith.constant 0 : i32
    %2 = arith.cmpi ne, %1, %c0_i32_0 : i32
    scf.if %2 {
      %c0_56 = arith.constant 0 : index
      %c0_57 = arith.constant 0 : index
      %c0_58 = arith.constant 0 : index
      %79 = vector.load %arg2[%c0_56, %c0_57, %c0_58] : memref<2x16x48xbf16, #tpu.memory_space<vmem>>, vector<2x16x48xbf16>
      %80 = vector.shape_cast %79 : vector<2x16x48xbf16> to vector<32x48xbf16>
      %c0_59 = arith.constant 0 : index
      %c0_60 = arith.constant 0 : index
      %81 = vector.load %arg3[%c0_59, %c0_60] : memref<48x32xbf16, #tpu.memory_space<vmem>>, vector<48x32xbf16>
      %cst_61 = arith.constant dense<0.000000e+00> : vector<32x32xf32>
      %82 = tpu.matmul %80, %81, %cst_61 {dimension_numbers = #tpu.dot_dimension_numbers<[1], [0], [0], [1], [0, 0, 1, 1], [], []>} : vector<32x48xbf16>, vector<48x32xbf16>, vector<32x32xf32> -> vector<32x32xf32>
      %c0_62 = arith.constant 0 : index
      %c0_63 = arith.constant 0 : index
      %83 = vector.load %arg4[%c0_62, %c0_63] : memref<1x32xf32, #tpu.memory_space<vmem>>, vector<1x32xf32>
      %84 = vector.broadcast %83 : vector<1x32xf32> to vector<32x32xf32>
      %85 = arith.addf %82, %84 : vector<32x32xf32>
      %86 = vector.shape_cast %85 : vector<32x32xf32> to vector<2x16x32xf32>
      %c0_64 = arith.constant 0 : index
      %c0_65 = arith.constant 0 : index
      %c0_66 = arith.constant 0 : index
      %87 = vector.load %arg22[%c0_64, %c0_65, %c0_66] : memref<2x16x32xf32, #tpu.memory_space<vmem>>, vector<2x16x32xf32>
      tpu.vector_store %arg22[%c0_64, %c0_65, %c0_66], %86 {strides = array<i32>} : memref<2x16x32xf32, #tpu.memory_space<vmem>>, vector<2x16x32xf32>,
    } else {
    }
    %c0 = arith.constant 0 : index
    %c0_1 = arith.constant 0 : index
    %c0_2 = arith.constant 0 : index
    %3 = vector.load %arg5[%c0, %c0_1, %c0_2] : memref<1x1x32xf32, #tpu.memory_space<vmem>>, vector<1x1x32xf32>
    %4 = vector.shape_cast %3 : vector<1x1x32xf32> to vector<1x32xf32>
    %c0_3 = arith.constant 0 : index
    %c0_4 = arith.constant 0 : index
    %c0_5 = arith.constant 0 : index
    %5 = vector.load %arg6[%c0_3, %c0_4, %c0_5] : memref<1x1x32xf32, #tpu.memory_space<vmem>>, vector<1x1x32xf32>
    %6 = vector.shape_cast %5 : vector<1x1x32xf32> to vector<1x32xf32>
    %c0_6 = arith.constant 0 : index
    %c0_7 = arith.constant 0 : index
    %c0_8 = arith.constant 0 : index
    %7 = vector.load %arg7[%c0_6, %c0_7, %c0_8] : memref<1x16x16xbf16, #tpu.memory_space<vmem>>, vector<1x16x16xbf16>
    %8 = vector.shape_cast %7 : vector<1x16x16xbf16> to vector<16x16xbf16>
    %c0_9 = arith.constant 0 : index
    %c0_10 = arith.constant 0 : index
    %c0_11 = arith.constant 0 : index
    %9 = vector.load %arg8[%c0_9, %c0_10, %c0_11] : memref<1x16x1xf32, #tpu.memory_space<vmem>>, vector<1x16x1xf32>
    %10 = vector.shape_cast %9 : vector<1x16x1xf32> to vector<16x1xf32>
    %c0_12 = arith.constant 0 : index
    %c0_13 = arith.constant 0 : index
    %c0_14 = arith.constant 0 : index
    %11 = vector.load %arg9[%c0_12, %c0_13, %c0_14] : memref<1x16x16xbf16, #tpu.memory_space<vmem>>, vector<1x16x16xbf16>
    %12 = vector.shape_cast %11 : vector<1x16x16xbf16> to vector<16x16xbf16>
    %c0_15 = arith.constant 0 : index
    %c0_16 = arith.constant 0 : index
    %c0_17 = arith.constant 0 : index
    %13 = vector.load %arg10[%c0_15, %c0_16, %c0_17] : memref<1x16x1xf32, #tpu.memory_space<vmem>>, vector<1x16x1xf32>
    %14 = vector.shape_cast %13 : vector<1x16x1xf32> to vector<16x1xf32>
    %c0_i32_18 = arith.constant 0 : i32
    %c2_i32 = arith.constant 2 : i32
    %15 = arith.addi %c0_i32_18, %c2_i32 : i32
    %c1_i32 = arith.constant 1 : i32
    scf.for %arg23 = %c0_i32_18 to %15 step %c1_i32  : i32 {
      %79 = arith.index_cast %arg23 : i32 to index
      %c0_56 = arith.constant 0 : index
      %c0_57 = arith.constant 0 : index
      %80 = vector.load %arg22[%79, %c0_56, %c0_57] : memref<2x16x32xf32, #tpu.memory_space<vmem>>, vector<1x16x32xf32>
      %81 = vector.shape_cast %80 : vector<1x16x32xf32> to vector<16x32xf32>
      %cst_58 = arith.constant dense<0.000000e+00> : vector<16xf32>
      %82 = vector.multi_reduction <add>, %81, %cst_58 [1] : vector<16x32xf32> to vector<16xf32>
      %83 = vector.shape_cast %82 : vector<16xf32> to vector<16x1xf32>
      %cst_59 = arith.constant 3.200000e+01 : f32
      %84 = vector.broadcast %cst_59 : f32 to vector<16x1xf32>
      %85 = arith.divf %83, %84 : vector<16x1xf32>
      %86 = vector.broadcast %85 : vector<16x1xf32> to vector<16x32xf32>
      %87 = arith.subf %81, %86 : vector<16x32xf32>
      %88 = arith.mulf %87, %87 : vector<16x32xf32>
      %cst_60 = arith.constant dense<0.000000e+00> : vector<16xf32>
      %89 = vector.multi_reduction <add>, %88, %cst_60 [1] : vector<16x32xf32> to vector<16xf32>
      %90 = vector.shape_cast %89 : vector<16xf32> to vector<16x1xf32>
      %cst_61 = arith.constant 3.200000e+01 : f32
      %91 = vector.broadcast %cst_61 : f32 to vector<16x1xf32>
      %92 = arith.divf %90, %91 : vector<16x1xf32>
      %93 = vector.broadcast %85 : vector<16x1xf32> to vector<16x32xf32>
      %94 = arith.subf %81, %93 : vector<16x32xf32>
      %cst_62 = arith.constant 9.99999974E-6 : f32
      %95 = vector.broadcast %cst_62 : f32 to vector<16x1xf32>
      %96 = arith.addf %92, %95 : vector<16x1xf32>
      %97 = math.rsqrt %96 : vector<16x1xf32>
      %98 = vector.broadcast %97 : vector<16x1xf32> to vector<16x32xf32>
      %99 = arith.mulf %94, %98 : vector<16x32xf32>
      %100 = vector.broadcast %4 : vector<1x32xf32> to vector<16x32xf32>
      %101 = arith.mulf %99, %100 : vector<16x32xf32>
      %102 = vector.broadcast %6 : vector<1x32xf32> to vector<16x32xf32>
      %103 = arith.addf %101, %102 : vector<16x32xf32>
      %104 = arith.truncf %103 : vector<16x32xf32> to vector<16x32xbf16>
      %cst_63 = arith.constant dense<0.000000e+00> : vector<16x32xf32>
      %105 = tpu.matmul %8, %104, %cst_63 {dimension_numbers = #tpu.dot_dimension_numbers<[1], [0], [0], [1], [0, 0, 1, 1], [], []>} : vector<16x16xbf16>, vector<16x32xbf16>, vector<16x32xf32> -> vector<16x32xf32>
      %106 = vector.broadcast %10 : vector<16x1xf32> to vector<16x32xf32>
      %107 = arith.addf %105, %106 : vector<16x32xf32>
      %cst_64 = arith.constant 5.000000e-01 : f32
      %108 = vector.broadcast %cst_64 : f32 to vector<16x32xf32>
      %109 = arith.mulf %108, %107 : vector<16x32xf32>
      %cst_65 = arith.constant 0.707106769 : f32
      %110 = vector.broadcast %cst_65 : f32 to vector<16x32xf32>
      %111 = arith.mulf %107, %110 : vector<16x32xf32>
      %112 = math.erf %111 : vector<16x32xf32>
      %cst_66 = arith.constant 1.000000e+00 : f32
      %113 = vector.broadcast %cst_66 : f32 to vector<16x32xf32>
      %114 = arith.addf %113, %112 : vector<16x32xf32>
      %115 = arith.mulf %109, %114 : vector<16x32xf32>
      %116 = arith.truncf %115 : vector<16x32xf32> to vector<16x32xbf16>
      %cst_67 = arith.constant dense<0.000000e+00> : vector<16x32xf32>
      %117 = tpu.matmul %12, %116, %cst_67 {dimension_numbers = #tpu.dot_dimension_numbers<[1], [0], [0], [1], [0, 0, 1, 1], [], []>} : vector<16x16xbf16>, vector<16x32xbf16>, vector<16x32xf32> -> vector<16x32xf32>
      %118 = arith.addf %81, %117 : vector<16x32xf32>
      %119 = vector.broadcast %14 : vector<16x1xf32> to vector<16x32xf32>
      %120 = arith.addf %118, %119 : vector<16x32xf32>
      %121 = arith.index_cast %arg23 : i32 to index
      %c0_68 = arith.constant 0 : index
      %c0_69 = arith.constant 0 : index
      %122 = vector.load %arg22[%121, %c0_68, %c0_69] : memref<2x16x32xf32, #tpu.memory_space<vmem>>, vector<1x16x32xf32>
      %123 = vector.shape_cast %122 : vector<1x16x32xf32> to vector<16x32xf32>
      %124 = vector.shape_cast %120 : vector<16x32xf32> to vector<1x16x32xf32>
      tpu.vector_store %arg22[%121, %c0_68, %c0_69], %124 {strides = array<i32>} : memref<2x16x32xf32, #tpu.memory_space<vmem>>, vector<1x16x32xf32>,
    }
    %c2_i32_19 = arith.constant 2 : i32
    %c0_20 = arith.constant 0 : index
    %c0_21 = arith.constant 0 : index
    %c0_22 = arith.constant 0 : index
    %16 = vector.load %arg11[%c0_20, %c0_21, %c0_22] : memref<1x1x32xf32, #tpu.memory_space<vmem>>, vector<1x1x32xf32>
    %17 = vector.shape_cast %16 : vector<1x1x32xf32> to vector<1x32xf32>
    %c0_23 = arith.constant 0 : index
    %c0_24 = arith.constant 0 : index
    %c0_25 = arith.constant 0 : index
    %18 = vector.load %arg12[%c0_23, %c0_24, %c0_25] : memref<1x1x32xf32, #tpu.memory_space<vmem>>, vector<1x1x32xf32>
    %19 = vector.shape_cast %18 : vector<1x1x32xf32> to vector<1x32xf32>
    %c0_26 = arith.constant 0 : index
    %c0_27 = arith.constant 0 : index
    %c0_28 = arith.constant 0 : index
    %20 = vector.load %arg13[%c0_26, %c0_27, %c0_28] : memref<1x32x64xbf16, #tpu.memory_space<vmem>>, vector<1x32x64xbf16>
    %21 = vector.shape_cast %20 : vector<1x32x64xbf16> to vector<32x64xbf16>
    %c0_29 = arith.constant 0 : index
    %c0_30 = arith.constant 0 : index
    %c0_31 = arith.constant 0 : index
    %22 = vector.load %arg14[%c0_29, %c0_30, %c0_31] : memref<1x1x64xf32, #tpu.memory_space<vmem>>, vector<1x1x64xf32>
    %23 = vector.shape_cast %22 : vector<1x1x64xf32> to vector<1x64xf32>
    %c0_32 = arith.constant 0 : index
    %c0_33 = arith.constant 0 : index
    %c0_34 = arith.constant 0 : index
    %24 = vector.load %arg15[%c0_32, %c0_33, %c0_34] : memref<1x64x32xbf16, #tpu.memory_space<vmem>>, vector<1x64x32xbf16>
    %25 = vector.shape_cast %24 : vector<1x64x32xbf16> to vector<64x32xbf16>
    %c0_35 = arith.constant 0 : index
    %c0_36 = arith.constant 0 : index
    %c0_37 = arith.constant 0 : index
    %26 = vector.load %arg16[%c0_35, %c0_36, %c0_37] : memref<1x1x32xf32, #tpu.memory_space<vmem>>, vector<1x1x32xf32>
    %27 = vector.shape_cast %26 : vector<1x1x32xf32> to vector<1x32xf32>
    %c0_i32_38 = arith.constant 0 : i32
    %c2_i32_39 = arith.constant 2 : i32
    %28 = arith.muli %c0_i32_38, %c2_i32_39 : i32
    %29 = arith.index_cast %28 : i32 to index
    %c0_40 = arith.constant 0 : index
    %c0_41 = arith.constant 0 : index
    %30 = vector.load %arg22[%29, %c0_40, %c0_41] : memref<2x16x32xf32, #tpu.memory_space<vmem>>, vector<2x16x32xf32>
    %cst = arith.constant dense<0.000000e+00> : vector<2x16xf32>
    %31 = vector.multi_reduction <add>, %30, %cst [2] : vector<2x16x32xf32> to vector<2x16xf32>
    %32 = vector.shape_cast %31 : vector<2x16xf32> to vector<2x16x1xf32>
    %cst_42 = arith.constant 3.200000e+01 : f32
    %33 = vector.broadcast %cst_42 : f32 to vector<2x16x1xf32>
    %34 = arith.divf %32, %33 : vector<2x16x1xf32>
    %35 = vector.broadcast %34 : vector<2x16x1xf32> to vector<2x16x32xf32>
    %36 = arith.subf %30, %35 : vector<2x16x32xf32>
    %37 = arith.mulf %36, %36 : vector<2x16x32xf32>
    %cst_43 = arith.constant dense<0.000000e+00> : vector<2x16xf32>
    %38 = vector.multi_reduction <add>, %37, %cst_43 [2] : vector<2x16x32xf32> to vector<2x16xf32>
    %39 = vector.shape_cast %38 : vector<2x16xf32> to vector<2x16x1xf32>
    %cst_44 = arith.constant 3.200000e+01 : f32
    %40 = vector.broadcast %cst_44 : f32 to vector<2x16x1xf32>
    %41 = arith.divf %39, %40 : vector<2x16x1xf32>
    %42 = vector.broadcast %34 : vector<2x16x1xf32> to vector<2x16x32xf32>
    %43 = arith.subf %30, %42 : vector<2x16x32xf32>
    %cst_45 = arith.constant 9.99999974E-6 : f32
    %44 = vector.broadcast %cst_45 : f32 to vector<2x16x1xf32>
    %45 = arith.addf %41, %44 : vector<2x16x1xf32>
    %46 = math.rsqrt %45 : vector<2x16x1xf32>
    %47 = vector.broadcast %46 : vector<2x16x1xf32> to vector<2x16x32xf32>
    %48 = arith.mulf %43, %47 : vector<2x16x32xf32>
    %49 = vector.shape_cast %17 : vector<1x32xf32> to vector<1x1x32xf32>
    %50 = vector.broadcast %49 : vector<1x1x32xf32> to vector<2x16x32xf32>
    %51 = arith.mulf %48, %50 : vector<2x16x32xf32>
    %52 = vector.shape_cast %19 : vector<1x32xf32> to vector<1x1x32xf32>
    %53 = vector.broadcast %52 : vector<1x1x32xf32> to vector<2x16x32xf32>
    %54 = arith.addf %51, %53 : vector<2x16x32xf32>
    %55 = vector.shape_cast %54 : vector<2x16x32xf32> to vector<32x32xf32>
    %56 = arith.truncf %55 : vector<32x32xf32> to vector<32x32xbf16>
    %cst_46 = arith.constant dense<0.000000e+00> : vector<32x64xf32>
    %57 = tpu.matmul %56, %21, %cst_46 {dimension_numbers = #tpu.dot_dimension_numbers<[1], [0], [0], [1], [0, 0, 1, 1], [], []>} : vector<32x32xbf16>, vector<32x64xbf16>, vector<32x64xf32> -> vector<32x64xf32>
    %58 = vector.broadcast %23 : vector<1x64xf32> to vector<32x64xf32>
    %59 = arith.addf %57, %58 : vector<32x64xf32>
    %cst_47 = arith.constant 5.000000e-01 : f32
    %60 = vector.broadcast %cst_47 : f32 to vector<32x64xf32>
    %61 = arith.mulf %60, %59 : vector<32x64xf32>
    %cst_48 = arith.constant 0.707106769 : f32
    %62 = vector.broadcast %cst_48 : f32 to vector<32x64xf32>
    %63 = arith.mulf %59, %62 : vector<32x64xf32>
    %64 = math.erf %63 : vector<32x64xf32>
    %cst_49 = arith.constant 1.000000e+00 : f32
    %65 = vector.broadcast %cst_49 : f32 to vector<32x64xf32>
    %66 = arith.addf %65, %64 : vector<32x64xf32>
    %67 = arith.mulf %61, %66 : vector<32x64xf32>
    %68 = arith.truncf %67 : vector<32x64xf32> to vector<32x64xbf16>
    %cst_50 = arith.constant dense<0.000000e+00> : vector<32x32xf32>
    %69 = tpu.matmul %68, %25, %cst_50 {dimension_numbers = #tpu.dot_dimension_numbers<[1], [0], [0], [1], [0, 0, 1, 1], [], []>} : vector<32x64xbf16>, vector<64x32xbf16>, vector<32x32xf32> -> vector<32x32xf32>
    %70 = vector.broadcast %27 : vector<1x32xf32> to vector<32x32xf32>
    %71 = arith.addf %69, %70 : vector<32x32xf32>
    %72 = vector.shape_cast %71 : vector<32x32xf32> to vector<2x16x32xf32>
    %73 = arith.addf %30, %72 : vector<2x16x32xf32>
    %74 = arith.index_cast %28 : i32 to index
    %c0_51 = arith.constant 0 : index
    %c0_52 = arith.constant 0 : index
    %75 = vector.load %arg22[%74, %c0_51, %c0_52] : memref<2x16x32xf32, #tpu.memory_space<vmem>>, vector<2x16x32xf32>
    tpu.vector_store %arg22[%74, %c0_51, %c0_52], %73 {strides = array<i32>} : memref<2x16x32xf32, #tpu.memory_space<vmem>>, vector<2x16x32xf32>,
    %c1_i32_53 = arith.constant 1 : i32
    %c1_i32_54 = arith.constant 1 : i32
    %76 = arith.cmpi eq, %arg1, %c1_i32_54 : i32
    %77 = arith.extui %76 : i1 to i32
    %c0_i32_55 = arith.constant 0 : i32
    %78 = arith.cmpi ne, %77, %c0_i32_55 : i32
    scf.if %78 {
      %c0_56 = arith.constant 0 : index
      %c0_57 = arith.constant 0 : index
      %c0_58 = arith.constant 0 : index
      %79 = vector.load %arg22[%c0_56, %c0_57, %c0_58] : memref<2x16x32xf32, #tpu.memory_space<vmem>>, vector<2x16x32xf32>
      %c0_59 = arith.constant 0 : index
      %c0_60 = arith.constant 0 : index
      %80 = vector.load %arg17[%c0_59, %c0_60] : memref<1x32xf32, #tpu.memory_space<vmem>>, vector<1x32xf32>
      %c0_61 = arith.constant 0 : index
      %c0_62 = arith.constant 0 : index
      %81 = vector.load %arg18[%c0_61, %c0_62] : memref<1x32xf32, #tpu.memory_space<vmem>>, vector<1x32xf32>
      %cst_63 = arith.constant dense<0.000000e+00> : vector<2x16xf32>
      %82 = vector.multi_reduction <add>, %79, %cst_63 [2] : vector<2x16x32xf32> to vector<2x16xf32>
      %83 = vector.shape_cast %82 : vector<2x16xf32> to vector<2x16x1xf32>
      %cst_64 = arith.constant 3.200000e+01 : f32
      %84 = vector.broadcast %cst_64 : f32 to vector<2x16x1xf32>
      %85 = arith.divf %83, %84 : vector<2x16x1xf32>
      %86 = vector.broadcast %85 : vector<2x16x1xf32> to vector<2x16x32xf32>
      %87 = arith.subf %79, %86 : vector<2x16x32xf32>
      %88 = arith.mulf %87, %87 : vector<2x16x32xf32>
      %cst_65 = arith.constant dense<0.000000e+00> : vector<2x16xf32>
      %89 = vector.multi_reduction <add>, %88, %cst_65 [2] : vector<2x16x32xf32> to vector<2x16xf32>
      %90 = vector.shape_cast %89 : vector<2x16xf32> to vector<2x16x1xf32>
      %cst_66 = arith.constant 3.200000e+01 : f32
      %91 = vector.broadcast %cst_66 : f32 to vector<2x16x1xf32>
      %92 = arith.divf %90, %91 : vector<2x16x1xf32>
      %93 = vector.broadcast %85 : vector<2x16x1xf32> to vector<2x16x32xf32>
      %94 = arith.subf %79, %93 : vector<2x16x32xf32>
      %cst_67 = arith.constant 9.99999974E-6 : f32
      %95 = vector.broadcast %cst_67 : f32 to vector<2x16x1xf32>
      %96 = arith.addf %92, %95 : vector<2x16x1xf32>
      %97 = math.rsqrt %96 : vector<2x16x1xf32>
      %98 = vector.broadcast %97 : vector<2x16x1xf32> to vector<2x16x32xf32>
      %99 = arith.mulf %94, %98 : vector<2x16x32xf32>
      %100 = vector.shape_cast %80 : vector<1x32xf32> to vector<1x1x32xf32>
      %101 = vector.broadcast %100 : vector<1x1x32xf32> to vector<2x16x32xf32>
      %102 = arith.mulf %99, %101 : vector<2x16x32xf32>
      %103 = vector.shape_cast %81 : vector<1x32xf32> to vector<1x1x32xf32>
      %104 = vector.broadcast %103 : vector<1x1x32xf32> to vector<2x16x32xf32>
      %105 = arith.addf %102, %104 : vector<2x16x32xf32>
      %cst_68 = arith.constant dense<0.000000e+00> : vector<2x32xf32>
      %106 = vector.multi_reduction <add>, %105, %cst_68 [1] : vector<2x16x32xf32> to vector<2x32xf32>
      %cst_69 = arith.constant 1.600000e+01 : f32
      %107 = vector.broadcast %cst_69 : f32 to vector<2x32xf32>
      %108 = arith.divf %106, %107 : vector<2x32xf32>
      %109 = arith.truncf %108 : vector<2x32xf32> to vector<2x32xbf16>
      %c0_70 = arith.constant 0 : index
      %c0_71 = arith.constant 0 : index
      %110 = vector.load %arg19[%c0_70, %c0_71] : memref<32x128xbf16, #tpu.memory_space<vmem>>, vector<32x128xbf16>
      %cst_72 = arith.constant dense<0.000000e+00> : vector<2x128xf32>
      %111 = tpu.matmul %109, %110, %cst_72 {dimension_numbers = #tpu.dot_dimension_numbers<[1], [0], [0], [1], [0, 0, 1, 1], [], []>} : vector<2x32xbf16>, vector<32x128xbf16>, vector<2x128xf32> -> vector<2x128xf32>
      %c0_73 = arith.constant 0 : index
      %c0_74 = arith.constant 0 : index
      %112 = vector.load %arg20[%c0_73, %c0_74] : memref<1x128xf32, #tpu.memory_space<vmem>>, vector<1x128xf32>
      %113 = vector.broadcast %112 : vector<1x128xf32> to vector<2x128xf32>
      %114 = arith.addf %111, %113 : vector<2x128xf32>
      %c0_75 = arith.constant 0 : index
      %c0_76 = arith.constant 0 : index
      %115 = vector.load %arg21[%c0_75, %c0_76] : memref<2x128xf32, #tpu.memory_space<vmem>>, vector<2x128xf32>
      tpu.vector_store %arg21[%c0_75, %c0_76], %114 {strides = array<i32>} : memref<2x128xf32, #tpu.memory_space<vmem>>, vector<2x128xf32>,
    } else {
    }
    return
  }
  func.func @transform_0(%arg0: i32, %arg1: i32) -> (i32, i32, i32) {
    %c0_i32 = arith.constant 0 : i32
    %c0_i32_0 = arith.constant 0 : i32
    %c0_i32_1 = arith.constant 0 : i32
    return %arg0, %c0_i32, %c0_i32_0 : i32, i32, i32
  }
  func.func @transform_1(%arg0: i32, %arg1: i32) -> (i32, i32) {
    %c0_i32 = arith.constant 0 : i32
    %c0_i32_0 = arith.constant 0 : i32
    %c0_i32_1 = arith.constant 0 : i32
    return %c0_i32, %c0_i32_0 : i32, i32
  }
  func.func @transform_2(%arg0: i32, %arg1: i32) -> (i32, i32) {
    %c0_i32 = arith.constant 0 : i32
    %c0_i32_0 = arith.constant 0 : i32
    %c0_i32_1 = arith.constant 0 : i32
    return %c0_i32, %c0_i32_0 : i32, i32
  }
  func.func @transform_3(%arg0: i32, %arg1: i32) -> (i32, i32, i32) {
    %c0_i32 = arith.constant 0 : i32
    %c0_i32_0 = arith.constant 0 : i32
    %c0_i32_1 = arith.constant 0 : i32
    return %arg1, %c0_i32, %c0_i32_0 : i32, i32, i32
  }
  func.func @transform_4(%arg0: i32, %arg1: i32) -> (i32, i32, i32) {
    %c0_i32 = arith.constant 0 : i32
    %c0_i32_0 = arith.constant 0 : i32
    %c0_i32_1 = arith.constant 0 : i32
    return %arg1, %c0_i32, %c0_i32_0 : i32, i32, i32
  }
  func.func @transform_5(%arg0: i32, %arg1: i32) -> (i32, i32, i32) {
    %c0_i32 = arith.constant 0 : i32
    %c0_i32_0 = arith.constant 0 : i32
    %c0_i32_1 = arith.constant 0 : i32
    return %arg1, %c0_i32, %c0_i32_0 : i32, i32, i32
  }
  func.func @transform_6(%arg0: i32, %arg1: i32) -> (i32, i32, i32) {
    %c0_i32 = arith.constant 0 : i32
    %c0_i32_0 = arith.constant 0 : i32
    %c0_i32_1 = arith.constant 0 : i32
    return %arg1, %c0_i32, %c0_i32_0 : i32, i32, i32
  }
  func.func @transform_7(%arg0: i32, %arg1: i32) -> (i32, i32, i32) {
    %c0_i32 = arith.constant 0 : i32
    %c0_i32_0 = arith.constant 0 : i32
    %c0_i32_1 = arith.constant 0 : i32
    return %arg1, %c0_i32, %c0_i32_0 : i32, i32, i32
  }
  func.func @transform_8(%arg0: i32, %arg1: i32) -> (i32, i32, i32) {
    %c0_i32 = arith.constant 0 : i32
    %c0_i32_0 = arith.constant 0 : i32
    %c0_i32_1 = arith.constant 0 : i32
    return %arg1, %c0_i32, %c0_i32_0 : i32, i32, i32
  }
  func.func @transform_9(%arg0: i32, %arg1: i32) -> (i32, i32, i32) {
    %c0_i32 = arith.constant 0 : i32
    %c0_i32_0 = arith.constant 0 : i32
    %c0_i32_1 = arith.constant 0 : i32
    return %arg1, %c0_i32, %c0_i32_0 : i32, i32, i32
  }
  func.func @transform_10(%arg0: i32, %arg1: i32) -> (i32, i32, i32) {
    %c0_i32 = arith.constant 0 : i32
    %c0_i32_0 = arith.constant 0 : i32
    %c0_i32_1 = arith.constant 0 : i32
    return %arg1, %c0_i32, %c0_i32_0 : i32, i32, i32
  }
  func.func @transform_11(%arg0: i32, %arg1: i32) -> (i32, i32, i32) {
    %c0_i32 = arith.constant 0 : i32
    %c0_i32_0 = arith.constant 0 : i32
    %c0_i32_1 = arith.constant 0 : i32
    return %arg1, %c0_i32, %c0_i32_0 : i32, i32, i32
  }
  func.func @transform_12(%arg0: i32, %arg1: i32) -> (i32, i32, i32) {
    %c0_i32 = arith.constant 0 : i32
    %c0_i32_0 = arith.constant 0 : i32
    %c0_i32_1 = arith.constant 0 : i32
    return %arg1, %c0_i32, %c0_i32_0 : i32, i32, i32
  }
  func.func @transform_13(%arg0: i32, %arg1: i32) -> (i32, i32, i32) {
    %c0_i32 = arith.constant 0 : i32
    %c0_i32_0 = arith.constant 0 : i32
    %c0_i32_1 = arith.constant 0 : i32
    return %arg1, %c0_i32, %c0_i32_0 : i32, i32, i32
  }
  func.func @transform_14(%arg0: i32, %arg1: i32) -> (i32, i32, i32) {
    %c0_i32 = arith.constant 0 : i32
    %c0_i32_0 = arith.constant 0 : i32
    %c0_i32_1 = arith.constant 0 : i32
    return %arg1, %c0_i32, %c0_i32_0 : i32, i32, i32
  }
  func.func @transform_15(%arg0: i32, %arg1: i32) -> (i32, i32) {
    %c0_i32 = arith.constant 0 : i32
    %c0_i32_0 = arith.constant 0 : i32
    %c0_i32_1 = arith.constant 0 : i32
    return %c0_i32, %c0_i32_0 : i32, i32
  }
  func.func @transform_16(%arg0: i32, %arg1: i32) -> (i32, i32) {
    %c0_i32 = arith.constant 0 : i32
    %c0_i32_0 = arith.constant 0 : i32
    %c0_i32_1 = arith.constant 0 : i32
    return %c0_i32, %c0_i32_0 : i32, i32
  }
  func.func @transform_17(%arg0: i32, %arg1: i32) -> (i32, i32) {
    %c0_i32 = arith.constant 0 : i32
    %c0_i32_0 = arith.constant 0 : i32
    %c0_i32_1 = arith.constant 0 : i32
    return %c0_i32, %c0_i32_0 : i32, i32
  }
  func.func @transform_18(%arg0: i32, %arg1: i32) -> (i32, i32) {
    %c0_i32 = arith.constant 0 : i32
    %c0_i32_0 = arith.constant 0 : i32
    %c0_i32_1 = arith.constant 0 : i32
    return %c0_i32, %c0_i32_0 : i32, i32
  }
  func.func @transform_19(%arg0: i32, %arg1: i32) -> (i32, i32) {
    %c0_i32 = arith.constant 0 : i32
    %c0_i32_0 = arith.constant 0 : i32
    return %arg0, %c0_i32 : i32, i32
  }
}

</mosaic_0001>

<bundles_post_ra>
// kernel: tpu_custom_call.1
= control target key start
LH: loop header
LB: loop body
LE: loop exit
PB: predicated region body
PF: predicated region fallthrough
CT: control target
= control target key end

     0   :  { %s2491_s0 = inlined_call_operand.vmem [shape: bf16[2,16,48], index: 0, kind: input, shape index: {}]   ;;  %s2492_s1 = inlined_call_operand.vmem [shape: bf16[48,32], index: 1, kind: input, shape index: {}]   ;;  %s2493_s2 = inlined_call_operand.vmem [shape: f32[1,32], index: 2, kind: input, shape index: {}]   ;;  %s2494_s3 = inlined_call_operand.vmem [shape: f32[2,1,32], index: 3, kind: input, shape index: {}]   ;;  %s2495_s4 = inlined_call_operand.vmem [shape: f32[2,1,32], index: 4, kind: input, shape index: {}]   ;;  %s2496_s5 = inlined_call_operand.vmem [shape: bf16[2,16,16], index: 5, kind: input, shape index: {}]   ;;  %s2497_s6 = inlined_call_operand.vmem [shape: f32[2,16,1], index: 6, kind: input, shape index: {}]   ;;  %s2498_s7 = inlined_call_operand.vmem [shape: bf16[2,16,16], index: 7, kind: input, shape index: {}]   ;;  %s2499_s8 = inlined_call_operand.vmem [shape: f32[2,16,1], index: 8, kind: input, shape index: {}]   ;;  %s2500_s9 = inlined_call_operand.vmem [shape: f32[2,1,32], index: 9, kind: input, shape index: {}]   ;;  %s2501_s10 = inlined_call_operand.vmem [shape: f32[2,1,32], index: 10, kind: input, shape index: {}]   ;;  %s2502_s11 = inlined_call_operand.vmem [shape: bf16[2,32,64], index: 11, kind: input, shape index: {}]   ;;  %s2503_s12 = inlined_call_operand.vmem [shape: f32[2,1,64], index: 12, kind: input, shape index: {}]   ;;  %s2504_s13 = inlined_call_operand.vmem [shape: bf16[2,64,32], index: 13, kind: input, shape index: {}]   ;;  %s2505_s14 = inlined_call_operand.vmem [shape: f32[2,1,32], index: 14, kind: input, shape index: {}]   ;;  %s2506_s15 = inlined_call_operand.vmem [shape: f32[1,32], index: 15, kind: input, shape index: {}]   ;;  %s2507_s16 = inlined_call_operand.vmem [shape: f32[1,32], index: 16, kind: input, shape index: {}]   ;;  %s2508_s17 = inlined_call_operand.vmem [shape: bf16[32,128], index: 17, kind: input, shape index: {}]   ;;  %s2509_s18 = inlined_call_operand.vmem [shape: f32[1,128], index: 18, kind: input, shape index: {}]   ;;  %s2510_s19 = inlined_call_operand.hbm [shape: f32[2,128], index: 19, kind: output, shape index: {}]  }
   0x1   :  { %2516 = sst [smem:[#allocation9_spill]] %s2491_s0 }
   0x2   :  { %2517 = sst [smem:[#allocation10_spill]] %s2492_s1 }
   0x3   :  { %2518 = sst [smem:[#allocation11_spill]] %s2493_s2 }
   0x4   :  { %2519 = sst [smem:[#allocation12_spill]] %s2494_s3 }
   0x5   :  { %2520 = sst [smem:[#allocation13_spill]] %s2496_s5 }
   0x6   :  { %2521 = sst [smem:[#allocation14_spill]] %s2497_s6 }
   0x7   :  { %2522 = sst [smem:[#allocation15_spill]] %s2498_s7 }
   0x8   :  { %2523 = sst [smem:[#allocation16_spill]] %s2499_s8 }
   0x9   :  { %2524 = sst [smem:[#allocation17_spill]] %s2506_s15 }
   0xa   :  { %2525 = sst [smem:[#allocation18_spill]] %s2507_s16 }
   0xb   :  { %2526 = sst [smem:[#allocation19_spill]] %s2509_s18 }
   0xc   :  { %2527 = sst [smem:[#allocation20_spill]] %s2510_s19 }
   0xd   :  { %24 = vsyncpa [#allocation4], 0  ;;  %s2181_s0 = smov 0   ;;  %s2183_s30 = smov 0  }
   0xe   :  { %s2185_s20 = smov 0  }
   0xf LB: > { %2528 = sst [smem:[#allocation6_spill]] %s2065_s30  ;;  %s39_s1 = sadd.s32 1, %s2065_s30  ;;  %s2069_s20 = sphi %s2185_s20, %s30_s20   ;;  %s2065_s30 = sphi %s2183_s30, %s2553_s30   ;;  %s2061_s0 = sphi %s2181_s0, %s2552_s0  }
  0x10   : > { %2529 = sst [smem:[#allocation7_spill]] %s2069_s20  ;;  %p40_p0 = scmp.ge.s32.totalorder %s39_s1, 2 }
  0x11   : > { %p1790_p1 = scmp.ge.s32.totalorder %s2069_s20, 1  ;;  %p660_p2 = scmp.lt.s32.totalorder %s2069_s20, 3 }
  0x12   : > { %s2555_s1 = smov (%p40_p0, %s39_s1), 0 }
  0x13   : > { %2530 = sst [smem:[#allocation8_spill]] %s2555_s1  ;;  %p661_p3 = pnand %p1790_p1, %p660_p2 }
  0x14   : > { %p767_p4 = scmp.lt.s32.totalorder (!%p661_p3), %s2061_s0, 1  ;;  %s2532_s5 = sld [smem:[#allocation13_spill]] (!%p661_p3) }
  0x15   : > { %664 = sbr.rel (%p661_p3) target bundleno = 2450 (0x992), region = 96  ;;  %s2533_s6 = sld [smem:[#allocation14_spill]] (!%p661_p3) }
  0x16   : > { %s2534_s7 = sld [smem:[#allocation15_spill]] (!%p661_p3)  ;;  %s2535_s8 = sld [smem:[#allocation16_spill]] (!%p661_p3) }
  0x17   : > { %p1803_p5 = scmp.ne.s32.totalorder (!%p661_p3), %s2061_s0, 0 }
  0x1c   : > { %s2204_s22 = scalar_select %p767_p4, %s2061_s0, 1 }
  0x1d   : > { %819 = sbr.rel (%p1803_p5) target bundleno = 273 (0x111), region = 100  ;;  %vm865_vm0 = vcmask (!%p1803_p5), 392192   ;;  %s2537_s20 = sld [smem:[#allocation9_spill]] (!%p1803_p5)  ;;  %vm921_vm1 = vcmask (!%p1803_p5), 261120  }
  0x1e   : > { %s1844_s28 = sshll.u32 %s2204_s22, 3  ;;  %s1845_s29 = sshll.u32 %s2204_s22, 4 }
  0x1f   : > { %s2219_s30 = scalar_lea.vmem %s2532_s5, %s1844_s28  ;;  %s2224_s19 = scalar_lea.vmem %s2533_s6, %s1845_s29 }
  0x20   : > { %s2229_s24 = scalar_lea.vmem %s2534_s7, %s1844_s28  ;;  %s2234_s26 = scalar_lea.vmem %s2535_s8, %s1845_s29 }
  0x21   : > { %s798_s2 = scalar_lea.vmem %s2501_s10, %s2204_s22  ;;  %s2247_s15 = scalar_lea.vmem %s2502_s11, %s1845_s29 }
  0x22   : > { %s806_s28 = scalar_lea.vmem %s2503_s12, %s2204_s22  ;;  %s1849_s25 = sshll.u32 %s2204_s22, 5 }
  0x23   : > { %s814_s8 = scalar_lea.vmem %s2505_s14, %s2204_s22  ;;  %s2261_s21 = scalar_lea.vmem %s2504_s13, %s1849_s25  ;;  %v1969_v2 = vld [vmem:[%s2537_s20] sm:$0xff] (!%p1803_p5)  }
  0x24   : > { %s2536_s29 = sld [smem:[#allocation10_spill]]  ;;  %s2538_s3 = smov %s2537_s20  ;;  %1878 = vmatprep.mubr.msk.bf16.mxu0 %vm865_vm0, %v1969_v2 }
  0x25   : > { %v1970_v4 = vld [vmem:[%s2538_s3 + $0x8] sm:$0xff]   ;;  %s2539_s23 = sld [smem:[#allocation11_spill]] }
  0x2a   : > { %v1966_v0 = vld [vmem:[%s2536_s29] sm:$0xff]   ;;  %v1967_v1 = vld [vmem:[%s2536_s29 + $0x8] sm:$0xff]   ;;  %v1968_v3 = vld [vmem:[%s2536_s29 + $0x10] sm:$0xff]  }
  0x2b   : > { %1872 = vmatprep.subr.bf16.mxu0 %v1966_v0  ;;  %v1804_v5 = vld [vmem:[%s2539_s23] ss:$0 sm:$0xff] }
  0x2c   : > { %1873 = vmatpush3.bf16.msra.mxu0 %v1966_v0 }
  0x2d   : > { %1874 = vmatprep.subr.bf16.mxu0 %v1967_v1 }
  0x30   : > { %1875 = vmatpush3.bf16.msra.mxu0 %v1967_v1 }
  0x31   : > { %1876 = vmatprep.subr.bf16.mxu0 %v1968_v3 }
  0x34   : > { %1877 = vmatpush3.bf16.msra.mxu0 %v1968_v3 }
  0x37   : > { %1879 = vmatmul.mubr.msk.bf16.vlgmr.msra.gmra.mrb[0].mxu0 %vm865_vm0, %v1970_v4 }
 0x10a   : > { %v1880_v6 = vpop.f32.mrb[0].mxu0 }
 0x10b   : > { %v915_v7 = vadd.f32 %v1880_v6, %v1804_v5  ;;  %v906_v8 = vpop.f32.mrb[1].mxu0 }
 0x10c   : > { %v907_v9 = vadd.f32 %v1804_v5, %v906_v8  ;;  %v1881_v10 = vpop.f32.mrb[2].mxu0 }
 0x10d   : > { %924 = vst.msk [vmem:[#allocation2 + $0x10] sm:$0xff] %vm921_vm1, %v915_v7  ;;  %v918_v11 = vadd.f32 %v1881_v10, %v1804_v5  ;;  %v909_v12 = vpop.f32.mrb[3].mxu0 }
 0x10e   : > { %922 = vst.msk [vmem:[#allocation2] sm:$0xff] %vm921_vm1, %v907_v9  ;;  %v910_v13 = vadd.f32 %v1804_v5, %v909_v12 }
 0x10f   : > { %925 = vst.msk [vmem:[#allocation2 + $0x18] sm:$0xff] %vm921_vm1, %v918_v11 }
 0x110   : > { %923 = vst.msk [vmem:[#allocation2 + $0x8] sm:$0xff] %vm921_vm1, %v910_v13 }
 0x111 PF: > { %s2540_s20 = sld [smem:[#allocation12_spill]]  ;;  %s2542_s5 = scalar_lea.vmem %s2495_s4, %s2204_s22  ;;  %v2297_v16 = vld [vmem:[%s2219_s30] sm:$0xf]  ;;  %v2300_v17 = vld [vmem:[%s2219_s30 + $0x4] sm:$0xf]  ;;  %v2306_v19 = vld [vmem:[%s2224_s19 + $0x8] sm:$0xff] }
 0x112   : > { %v2294_v15 = vld [vmem:[%s2542_s5] ss:$0 sm:$0xff]  ;;  %v2312_v21 = vld [vmem:[%s2229_s24 + $0x4] sm:$0xf]  ;;  %v2318_v23 = vld [vmem:[%s2234_s26 + $0x8] sm:$0xff]  ;;  %s2320_s6 = smov 0  }
 0x113   : > { %v2303_v18 = vld [vmem:[%s2224_s19] sm:$0xff] }
 0x114   : > { %v2309_v20 = vld [vmem:[%s2229_s24] sm:$0xf] }
 0x115   : > { %v2315_v22 = vld [vmem:[%s2234_s26] sm:$0xff] }
 0x117   : > { %s2541_s25 = scalar_lea.vmem %s2540_s20, %s2204_s22 }
 0x118   : > { %v2287_v14 = vld [vmem:[%s2541_s25] ss:$0 sm:$0xff] }
 0x119 LB: >> { %s1812_s30 = sshll.u32 %s2073_s6, 4  ;;  %vm946_vm2 = vcmask 261120   ;;  %v2075_v38 = vmov 0.0   ;;  %vm2076_vm3 = vmmov 0   ;;  %v2077_v39 = vmov 0   ;;  %s941_s6 = sadd.s32 1, %s2073_s6   ;;  %s2073_s6 = sphi %s2320_s6, %s941_s6  }
 0x11a   : >> { %s2326_s19 = scalar_lea.vmem [#allocation2], %s1812_s30  ;;  %1882 = vmatprep.subr.bf16.mxu0 %v2075_v38  ;;  %1888 = vmatprep.subr.bf16.mxu1 %v2075_v38  ;;  %v1815_v55 = vcombine.low %v2297_v16, %v2300_v17  ;;  %vm1006_vm4 = vcmask 130048   ;;  %v1817_v11 = vcombine.low %v2309_v20, %v2312_v21  ;;  %p938_p6 = scmp.ge.s32.totalorder %s941_s6, 2  }
 0x11b   : >> { %v2329_v24 = vld [vmem:[%s2326_s19] sm:$0xff]  ;;  %v2332_v25 = vld [vmem:[%s2326_s19 + $0x8] sm:$0xff]  ;;  %1884 = vmatprep.mubr.msk.bf16.mxu0 %vm2076_vm3, %v2075_v38  ;;  %1890 = vmatprep.mubr.msk.bf16.mxu1 %vm2076_vm3, %v2075_v38  ;;  %s2543_s26 = scalar_lea.vmem (%p938_p6), %s2500_s9, %s2204_s22  ;;  %vm1348_vm5 = vcmask (%p938_p6), 523264   ;;  %p1833_p7 = scmp.ne.s32.totalorder (%p938_p6), %s2061_s0, 1 }
 0x11c   : >> { %v947_v26 = vsel %vm946_vm2, %v2329_v24, 0.0  ;;  %v950_v27 = vsel %vm946_vm2, %v2332_v25, 0.0  ;;  %1972 = vset.pattern.permute.xlu1 %v2077_v39  ;;  %1971 = vset.pattern.permute.xlu0 %v2077_v39 }
 0x11d   : >> { %948 = vadd.xlane.f32.xlu0 %v947_v26 }
 0x121   : >> { %951 = vadd.xlane.f32.xlu0 %v950_v27 }
 0x137   : >> { %993 = vperm.xlu0 %1971, %v2303_v18  }
 0x1aa   : >> { %v949_v28 = vpop.xlane.xlu0 %948 }
 0x1ab   : >> { %v954_v29 = vmul.f32 0.03125, %v949_v28 }
 0x1ad   : >> { %v956_v30 = vsub.f32 %v2329_v24, %v954_v29 }
 0x1ae   : >> { %v952_v31 = vpop.xlane.xlu0 %951 }
 0x1af   : >> { %v955_v32 = vmul.f32 0.03125, %v952_v31  ;;  %v958_v33 = vmul.f32 %v956_v30, %v956_v30 }
 0x1b1   : >> { %v957_v34 = vsub.f32 %v2332_v25, %v955_v32  ;;  %v960_v35 = vsel %vm946_vm2, %v958_v33, 0.0 }
 0x1b2   : >> { %961 = vadd.xlane.f32.xlu1 %v960_v35 }
 0x1b3   : >> { %v959_v36 = vmul.f32 %v957_v34, %v957_v34 }
 0x1b5   : >> { %v963_v37 = vsel %vm946_vm2, %v959_v36, 0.0 }
 0x1b6   : >> { %964 = vadd.xlane.f32.xlu1 %v963_v37  ;;  %v994_v56 = vpop.permute.xlu0 %993 }
 0x1c7   : >> { %998 = vperm.xlu1 %1972, %v2306_v19  }
 0x1cb   : >> { %1115 = vperm.xlu1 %1972, %v2315_v22  }
 0x1cf   : >> { %1120 = vperm.xlu1 %1972, %v2318_v23  }
 0x23f   : >> { %v962_v40 = vpop.xlane.xlu1 %961 }
 0x240   : >> { %v966_v41 = vmul.f32 0.03125, %v962_v40 }
 0x242   : >> { %v968_v42 = vadd.f32 1e-05, %v966_v41 }
 0x243   : >> { %v965_v43 = vpop.xlane.xlu1 %964 }
 0x244   : >> { %1973 = vrsqrt.f32 %v968_v42  ;;  %v967_v44 = vmul.f32 0.03125, %v965_v43 }
 0x246   : >> { %v969_v45 = vadd.f32 1e-05, %v967_v44 }
 0x247   : >> { %v999_v60 = vpop.permute.xlu1 %998 }
 0x248   : >> { %1975 = vrsqrt.f32 %v969_v45 }
 0x24b   : >> { %v1116_v12 = vpop.permute.xlu1 %1115 }
 0x24e   : >> { %v1974_v46 = vpop.eup %1973 }
 0x24f   : >> { %v972_v47 = vmul.f32 %v1974_v46, %v956_v30  ;;  %v1121_v32 = vpop.permute.xlu1 %1120 }
 0x251   : >> { %v980_v50 = vmul.f32 %v2287_v14, %v972_v47 }
 0x252   : >> { %v1976_v48 = vpop.eup %1975 }
 0x253   : >> { %v973_v49 = vmul.f32 %v1976_v48, %v957_v34  ;;  %v988_v52 = vadd.f32 %v2294_v15, %v980_v50  ;;  %v1981_v50 = vld [vmem:[%s2247_s15] sm:$0xff] (%p938_p6)  }
 0x255   : >> { %v981_v51 = vmul.f32 %v2287_v14, %v973_v49 }
 0x257   : >> { %v989_v53 = vadd.f32 %v2294_v15, %v981_v51  ;;  %v1982_v51 = vld [vmem:[%s2247_s15 + $0x8] sm:$0xff] (%p938_p6)  }
 0x259   : >> { %v990_v54 = vpack.c.bf16 %v989_v53, %v988_v52 }
 0x25b   : >> { %1883 = vmatpush3.bf16.msra.mxu0 %v990_v54 }
 0x25c   : > { %1894 = vmatprep.subr.bf16.mxu0 (%p938_p6), %v1981_v50 }
 0x25e   : >> { %1885 = vmatmul.mubr.msk.bf16.vlgmr.msra.gmra.mrb[0].mxu0 %vm1006_vm4, %v1815_v55 }
 0x25f   : > { %1895 = vmatpush3.bf16.msra.mxu0 (%p938_p6), %v1981_v50 }
 0x260   : > { %1896 = vmatprep.subr.bf16.mxu0 (%p938_p6), %v1982_v51 }
 0x263   : > { %1897 = vmatpush3.bf16.msra.mxu0 (%p938_p6), %v1982_v51 }
 0x331   : >> { %v1044_v57 = vpop.f32.mrb[0].mxu0 }
 0x332   : >> { %v1045_v58 = vadd.f32 %v1044_v57, %v994_v56  ;;  %v1886_v59 = vpop.f32.mrb[1].mxu0 }
 0x333   : >> { %v1047_v61 = vpop.f32.mrb[2].mxu0 }
 0x334   : >> { %v1053_v62 = vmul.f32 0.70710677, %v1045_v58  ;;  %v1048_v63 = vadd.f32 %v1047_v61, %v999_v60  ;;  %v1887_v0 = vpop.f32.mrb[3].mxu0  ;;  %v1051_v5 = vmul.f32 0.5, %v1045_v58 }
 0x336   : >> { %1977 = verf.f32 %v1053_v62  ;;  %v1054_v1 = vmul.f32 0.70710677, %v1048_v63  ;;  %v1052_v6 = vmul.f32 0.5, %v1048_v63 }
 0x338   : >> { %1979 = verf.f32 %v1054_v1 }
 0x340   : >> { %v1978_v2 = vpop.eup %1977 }
 0x341   : >> { %v1057_v3 = vadd.f32 1.0, %v1978_v2  ;;  %v1819_v2 = vld [vmem:[%s2543_s26] ss:$0 sm:$0xff] (%p938_p6) }
 0x342   : >> { %v1980_v4 = vpop.eup %1979 }
 0x343   : >> { %v1058_v7 = vadd.f32 1.0, %v1980_v4  ;;  %v1059_v8 = vmul.f32 %v1057_v3, %v1051_v5 }
 0x345   : >> { %v1060_v9 = vmul.f32 %v1058_v7, %v1052_v6  ;;  %v1820_v7 = vld [vmem:[%s798_s2] ss:$0 sm:$0xff] (%p938_p6) }
 0x347   : >> { %v1061_v10 = vpack.c.bf16 %v1060_v9, %v1059_v8 }
 0x349   : >> { %1889 = vmatpush3.bf16.msra.mxu1 %v1061_v10 }
 0x34c   : >> { %1891 = vmatmul.mubr.msk.bf16.vlgmr.msra.gmra.mrb[0].mxu1 %vm1006_vm4, %v1817_v11 }
 0x41f   : >> { %v1104_v13 = vpop.f32.mrb[0].mxu1 }
 0x420   : >> { %v1111_v26 = vadd.f32 %v1104_v13, %v2329_v24  ;;  %v1892_v27 = vpop.f32.mrb[1].mxu1  ;;  %940 = sbr.rel (!%p938_p6) target bundleno = 281 (0x119), region = 176 }
 0x421   : >> { %v1107_v28 = vpop.f32.mrb[2].mxu1 }
 0x422   : >> { %v1123_v29 = vadd.f32 %v1116_v12, %v1111_v26  ;;  %v1112_v30 = vadd.f32 %v1107_v28, %v2332_v25  ;;  %v1893_v31 = vpop.f32.mrb[3].mxu1 }
 0x424   : >> { %1125 = vst.msk [vmem:[%s2326_s19] sm:$0xff] %vm946_vm2, %v1123_v29  ;;  %v1124_v33 = vadd.f32 %v1121_v32, %v1112_v30  ;;  %v1983_v32 = vld [vmem:[%s2261_s21] sm:$0xff] (%p938_p6)  }
 0x425   : > { %1902 = vmatprep.subr.bf16.mxu1 (%p938_p6), %v1983_v32 }
 0x426   : >> { %1126 = vst.msk [vmem:[%s2326_s19 + $0x8] sm:$0xff] %vm946_vm2, %v1124_v33  ;;  %1903 = vmatpush3.bf16.msra.mxu1 (%p938_p6), %v1983_v32  ;;  %v1984_v33 = vld [vmem:[%s2261_s21 + $0x8] sm:$0xff] (%p938_p6)  }
 0x427   : > { %1904 = vmatprep.subr.bf16.mxu1 %v1984_v33  ;;  %vm2079_vm6 = vmmov (!%p1833_p7), 0   ;;  %s2544_s16 = sld [smem:[#allocation17_spill]] (!%p1833_p7)  ;;  %s2545_s6 = sld [smem:[#allocation18_spill]] (!%p1833_p7)  ;;  %vm1532_vm7 = vcmask (!%p1833_p7), 1041409  }
 0x428   : > { %s2546_s15 = sld [smem:[#allocation19_spill]] (!%p1833_p7) }
 0x42a   : > { %1905 = vmatpush3.bf16.msra.mxu1 %v1984_v33 }
 0x42d   : > { %v2365_v34 = vld [vmem:[#allocation2] sm:$0xff]  ;;  %v2367_v24 = vld [vmem:[#allocation2 + $0x10] sm:$0xff]  ;;  %v2369_v35 = vld [vmem:[#allocation2 + $0x8] sm:$0xff] }
 0x42e   : > { %v1148_v25 = vsel %vm946_vm2, %v2365_v34, 0.0  ;;  %v1154_v36 = vsel %vm946_vm2, %v2367_v24, 0.0  ;;  %v2375_v37 = vld [vmem:[#allocation2 + $0x18] sm:$0xff]  ;;  %v1151_v38 = vsel %vm946_vm2, %v2369_v35, 0.0 }
 0x42f   : > { %1149 = vadd.xlane.f32.xlu0 %v1148_v25  ;;  %1155 = vadd.xlane.f32.xlu1 %v1154_v36  ;;  %v1157_v14 = vsel %vm946_vm2, %v2375_v37, 0.0  ;;  %v1985_v25 = vld [vmem:[%s2261_s21 + $0x10] sm:$0xff]   ;;  %v1986_v36 = vld [vmem:[%s2261_s21 + $0x18] sm:$0xff]  }
 0x430   : > { %1906 = vmatprep.subr.bf16.mxu1 %v1985_v25 }
 0x431   : > { %1907 = vmatpush3.bf16.msra.mxu1 %v1985_v25 }
 0x432   : > { %1908 = vmatprep.subr.bf16.mxu1 %v1986_v36 }
 0x433   : > { %1152 = vadd.xlane.f32.xlu0 %v1151_v38  ;;  %1158 = vadd.xlane.f32.xlu1 %v1157_v14  ;;  %v1821_v38 = vld [vmem:[%s806_s28] ss:$0 sm:$0xff] }
 0x435   : > { %1909 = vmatpush3.bf16.msra.mxu1 %v1986_v36 }
 0x4bc   : > { %v1150_v15 = vpop.xlane.xlu0 %1149  ;;  %v1156_v16 = vpop.xlane.xlu1 %1155 }
 0x4bd   : > { %v1161_v17 = vmul.f32 0.03125, %v1150_v15  ;;  %v1163_v18 = vmul.f32 0.03125, %v1156_v16 }
 0x4bf   : > { %v1165_v19 = vsub.f32 %v2365_v34, %v1161_v17  ;;  %v1167_v20 = vsub.f32 %v2367_v24, %v1163_v18 }
 0x4c0   : > { %v1153_v21 = vpop.xlane.xlu0 %1152  ;;  %v1159_v22 = vpop.xlane.xlu1 %1158 }
 0x4c1   : > { %v1162_v23 = vmul.f32 0.03125, %v1153_v21  ;;  %v1164_v39 = vmul.f32 0.03125, %v1159_v22  ;;  %v1169_v40 = vmul.f32 %v1165_v19, %v1165_v19  ;;  %v1171_v41 = vmul.f32 %v1167_v20, %v1167_v20 }
 0x4c3   : > { %v1166_v42 = vsub.f32 %v2369_v35, %v1162_v23  ;;  %v1168_v43 = vsub.f32 %v2375_v37, %v1164_v39  ;;  %v1173_v44 = vsel %vm946_vm2, %v1169_v40, 0.0  ;;  %v1179_v45 = vsel %vm946_vm2, %v1171_v41, 0.0 }
 0x4c4   : > { %1174 = vadd.xlane.f32.xlu0 %v1173_v44 }
 0x4c5   : > { %v1170_v46 = vmul.f32 %v1166_v42, %v1166_v42  ;;  %v1172_v47 = vmul.f32 %v1168_v43, %v1168_v43 }
 0x4c7   : > { %v1176_v48 = vsel %vm946_vm2, %v1170_v46, 0.0  ;;  %v1182_v49 = vsel %vm946_vm2, %v1172_v47, 0.0 }
 0x4c8   : > { %1180 = vadd.xlane.f32.xlu0 %v1179_v45  ;;  %1177 = vadd.xlane.f32.xlu1 %v1176_v48 }
 0x4cc   : > { %1183 = vadd.xlane.f32.xlu1 %v1182_v49 }
 0x551   : > { %v1175_v52 = vpop.xlane.xlu0 %1174 }
 0x552   : > { %v1185_v53 = vmul.f32 0.03125, %v1175_v52 }
 0x554   : > { %v1189_v54 = vadd.f32 1e-05, %v1185_v53 }
 0x555   : > { %v1178_v55 = vpop.xlane.xlu1 %1177  ;;  %v1181_v56 = vpop.xlane.xlu0 %1180 }
 0x556   : > { %1987 = vrsqrt.f32 %v1189_v54  ;;  %v1186_v57 = vmul.f32 0.03125, %v1178_v55  ;;  %v1187_v58 = vmul.f32 0.03125, %v1181_v56 }
 0x558   : > { %v1190_v59 = vadd.f32 1e-05, %v1186_v57  ;;  %v1191_v60 = vadd.f32 1e-05, %v1187_v58 }
 0x559   : > { %v1184_v61 = vpop.xlane.xlu1 %1183 }
 0x55a   : > { %1989 = vrsqrt.f32 %v1190_v59  ;;  %v1188_v62 = vmul.f32 0.03125, %v1184_v61  ;;  %v1826_v59 = vld [vmem:[%s814_s8] ss:$0 sm:$0xff] }
 0x55b   : > { %1991 = vrsqrt.f32 %v1191_v60 }
 0x55c   : > { %v1192_v63 = vadd.f32 1e-05, %v1188_v62 }
 0x55e   : > { %1993 = vrsqrt.f32 %v1192_v63 }
 0x560   : > { %v1988_v0 = vpop.eup %1987 }
 0x561   : > { %v1197_v1 = vmul.f32 %v1988_v0, %v1165_v19 }
 0x563   : > { %v1207_v6 = vmul.f32 %v1819_v2, %v1197_v1 }
 0x564   : > { %v1990_v3 = vpop.eup %1989 }
 0x565   : > { %v1992_v4 = vpop.eup %1991  ;;  %v1198_v5 = vmul.f32 %v1990_v3, %v1166_v42  ;;  %v1217_v11 = vadd.f32 %v1820_v7, %v1207_v6 }
 0x566   : > { %v1199_v8 = vmul.f32 %v1992_v4, %v1167_v20 }
 0x567   : > { %v1208_v9 = vmul.f32 %v1819_v2, %v1198_v5 }
 0x568   : > { %v1994_v10 = vpop.eup %1993  ;;  %v1209_v26 = vmul.f32 %v1819_v2, %v1199_v8 }
 0x569   : > { %v1218_v12 = vadd.f32 %v1820_v7, %v1208_v9  ;;  %v1200_v13 = vmul.f32 %v1994_v10, %v1168_v43 }
 0x56a   : > { %v1219_v29 = vadd.f32 %v1820_v7, %v1209_v26 }
 0x56b   : > { %v1221_v27 = vpack.c.bf16 %v1218_v12, %v1217_v11  ;;  %v1210_v28 = vmul.f32 %v1819_v2, %v1200_v13 }
 0x56d   : > { %1898 = vmatprep.mubr.msk.bf16.mxu0 %vm946_vm2, %v1221_v27  ;;  %v1220_v30 = vadd.f32 %v1820_v7, %v1210_v28 }
 0x56f   : > { %v1222_v31 = vpack.c.bf16 %v1220_v30, %v1219_v29 }
 0x571   : > { %1899 = vmatmul.mubr.msk.bf16.vlgmr.msra.gmra.mrb[0].mxu0 %vm946_vm2, %v1222_v31 }
 0x644   : > { %v1900_v14 = vpop.f32.mrb[0].mxu0 }
 0x645   : > { %v1290_v15 = vadd.f32 %v1900_v14, %v1821_v38  ;;  %v1281_v16 = vpop.f32.mrb[1].mxu0 }
 0x646   : > { %v1282_v17 = vadd.f32 %v1821_v38, %v1281_v16  ;;  %v1901_v18 = vpop.f32.mrb[2].mxu0 }
 0x647   : > { %v1302_v19 = vmul.f32 0.70710677, %v1290_v15  ;;  %v1293_v20 = vadd.f32 %v1901_v18, %v1821_v38  ;;  %v1284_v21 = vpop.f32.mrb[3].mxu0  ;;  %v1298_v47 = vmul.f32 0.5, %v1290_v15 }
 0x648   : > { %v1300_v22 = vmul.f32 0.70710677, %v1282_v17  ;;  %v1285_v23 = vadd.f32 %v1821_v38, %v1284_v21  ;;  %v1296_v50 = vmul.f32 0.5, %v1282_v17  ;;  %v2003_v21 = vld [vmem:[%s2508_s17] sm:$0xff] (!%p1833_p7)  }
 0x649   : > { %1995 = verf.f32 %v1302_v19  ;;  %v1303_v39 = vmul.f32 0.70710677, %v1293_v20  ;;  %v1299_v48 = vmul.f32 0.5, %v1293_v20 }
 0x64a   : > { %1997 = verf.f32 %v1300_v22  ;;  %v1301_v40 = vmul.f32 0.70710677, %v1285_v23  ;;  %v1297_v51 = vmul.f32 0.5, %v1285_v23  ;;  %v2078_v22 = vmov (!%p1833_p7), 0.0   ;;  %v2004_v23 = vld [vmem:[%s2508_s17 + $0x8] sm:$0xff] (!%p1833_p7)  }
 0x64b   : > { %1999 = verf.f32 %v1303_v39  ;;  %1914 = vmatprep.subr.bf16.mxu0 (!%p1833_p7), %v2078_v22  ;;  %1918 = vmatprep.mubr.msk.bf16.mxu0 (!%p1833_p7), %vm2079_vm6, %v2078_v22 }
 0x64c   : > { %2001 = verf.f32 %v1301_v40  ;;  %1915 = vmatpush3.bf16.msra.mxu0 (!%p1833_p7), %v2003_v21 }
 0x64d   : > { %1916 = vmatprep.subr.bf16.mxu0 (!%p1833_p7), %v2078_v22 }
 0x650   : > { %1917 = vmatpush3.bf16.msra.mxu0 (!%p1833_p7), %v2004_v23 }
 0x653   : > { %v1996_v41 = vpop.eup %1995 }
 0x654   : > { %v1998_v42 = vpop.eup %1997  ;;  %v1310_v43 = vadd.f32 1.0, %v1996_v41 }
 0x655   : > { %v2000_v44 = vpop.eup %1999  ;;  %v1308_v45 = vadd.f32 1.0, %v1998_v42 }
 0x656   : > { %v2002_v46 = vpop.eup %2001  ;;  %v1311_v49 = vadd.f32 1.0, %v2000_v44  ;;  %v1314_v53 = vmul.f32 %v1310_v43, %v1298_v47 }
 0x657   : > { %v1309_v52 = vadd.f32 1.0, %v2002_v46  ;;  %v1312_v55 = vmul.f32 %v1308_v45, %v1296_v50 }
 0x658   : > { %v1315_v54 = vmul.f32 %v1311_v49, %v1299_v48 }
 0x659   : > { %v1313_v56 = vmul.f32 %v1309_v52, %v1297_v51  ;;  %v1834_v52 = vld [vmem:[%s2544_s16] ss:$0 sm:$0xff] (!%p1833_p7) }
 0x65a   : > { %v1317_v57 = vpack.c.bf16 %v1315_v54, %v1314_v53 }
 0x65b   : > { %v1316_v58 = vpack.c.bf16 %v1313_v56, %v1312_v55  ;;  %v1835_v56 = vld [vmem:[%s2545_s6] ss:$0 sm:$0xff] (!%p1833_p7) }
 0x65d   : > { %1910 = vmatprep.mubr.msk.bf16.mxu1 %vm1348_vm5, %v1316_v58 }
 0x65e   : > { %1911 = vmatmul.mubr.msk.bf16.vlgmr.msra.gmra.mrb[0].mxu1 %vm1348_vm5, %v1317_v57 }
 0x731   : > { %v1912_v60 = vpop.f32.mrb[0].mxu1 }
 0x732   : > { %v1398_v61 = vadd.f32 %v1912_v60, %v1826_v59  ;;  %v1389_v62 = vpop.f32.mrb[1].mxu1 }
 0x733   : > { %v1390_v63 = vadd.f32 %v1826_v59, %v1389_v62  ;;  %v1913_v0 = vpop.f32.mrb[2].mxu1  ;;  %1415 = sbr.rel (%p1833_p7) target bundleno = 2415 (0x96f), region = 111 }
 0x734   : > { %v1406_v1 = vadd.f32 %v1398_v61, %v2367_v24  ;;  %v1401_v2 = vadd.f32 %v1913_v0, %v1826_v59  ;;  %v1392_v3 = vpop.f32.mrb[3].mxu1 }
 0x735   : > { %v1404_v4 = vadd.f32 %v1390_v63, %v2365_v34  ;;  %v1393_v5 = vadd.f32 %v1826_v59, %v1392_v3 }
 0x736   : > { %1410 = vst.msk [vmem:[#allocation2 + $0x10] sm:$0xff] %vm946_vm2, %v1406_v1  ;;  %v1407_v6 = vadd.f32 %v1401_v2, %v2375_v37 }
 0x737   : > { %1408 = vst.msk [vmem:[#allocation2] sm:$0xff] %vm946_vm2, %v1404_v4  ;;  %v1405_v7 = vadd.f32 %v1393_v5, %v2369_v35 }
 0x738   : > { %1411 = vst.msk [vmem:[#allocation2 + $0x18] sm:$0xff] %vm946_vm2, %v1407_v6 }
 0x739   : > { %1409 = vst.msk [vmem:[#allocation2 + $0x8] sm:$0xff] %vm946_vm2, %v1405_v7 }
 0x73d   : > { %v1418_v8 = vld [vmem:[#allocation2 + $0x10] sm:$0xff] }
 0x73e   : > { %v1416_v24 = vld [vmem:[#allocation2] sm:$0xff]  ;;  %v1428_v10 = vsel %vm946_vm2, %v1418_v8, 0.0 }
 0x73f   : > { %v1422_v34 = vsel %vm946_vm2, %v1416_v24, 0.0  ;;  %v1419_v11 = vld [vmem:[#allocation2 + $0x18] sm:$0xff]  ;;  %1429 = vadd.xlane.f32.xlu1 %v1428_v10 }
 0x740   : > { %v1417_v9 = vld [vmem:[#allocation2 + $0x8] sm:$0xff]  ;;  %1423 = vadd.xlane.f32.xlu0 %v1422_v34  ;;  %v1431_v35 = vsel %vm946_vm2, %v1419_v11, 0.0 }
 0x741   : > { %v1425_v37 = vsel %vm946_vm2, %v1417_v9, 0.0 }
 0x743   : > { %1432 = vadd.xlane.f32.xlu1 %v1431_v35 }
 0x744   : > { %1426 = vadd.xlane.f32.xlu0 %v1425_v37 }
 0x7cc   : > { %v1430_v13 = vpop.xlane.xlu1 %1429 }
 0x7cd   : > { %v1424_v12 = vpop.xlane.xlu0 %1423  ;;  %v1436_v27 = vmul.f32 0.03125, %v1430_v13 }
 0x7ce   : > { %v1434_v26 = vmul.f32 0.03125, %v1424_v12 }
 0x7cf   : > { %v1440_v29 = vsub.f32 %v1418_v8, %v1436_v27 }
 0x7d0   : > { %v1438_v28 = vsub.f32 %v1416_v24, %v1434_v26  ;;  %v1433_v31 = vpop.xlane.xlu1 %1432 }
 0x7d1   : > { %v1427_v30 = vpop.xlane.xlu0 %1426  ;;  %v1437_v33 = vmul.f32 0.03125, %v1433_v31  ;;  %v1444_v36 = vmul.f32 %v1440_v29, %v1440_v29 }
 0x7d2   : > { %v1435_v32 = vmul.f32 0.03125, %v1427_v30  ;;  %v1442_v25 = vmul.f32 %v1438_v28, %v1438_v28 }
 0x7d3   : > { %v1441_v14 = vsub.f32 %v1419_v11, %v1437_v33  ;;  %v1452_v16 = vsel %vm946_vm2, %v1444_v36, 0.0 }
 0x7d4   : > { %v1439_v38 = vsub.f32 %v1417_v9, %v1435_v32  ;;  %v1446_v15 = vsel %vm946_vm2, %v1442_v25, 0.0 }
 0x7d5   : > { %1447 = vadd.xlane.f32.xlu0 %v1446_v15  ;;  %v1445_v18 = vmul.f32 %v1441_v14, %v1441_v14 }
 0x7d6   : > { %v1443_v17 = vmul.f32 %v1439_v38, %v1439_v38 }
 0x7d7   : > { %v1455_v20 = vsel %vm946_vm2, %v1445_v18, 0.0 }
 0x7d8   : > { %v1449_v19 = vsel %vm946_vm2, %v1443_v17, 0.0 }
 0x7d9   : > { %1453 = vadd.xlane.f32.xlu0 %v1452_v16  ;;  %1450 = vadd.xlane.f32.xlu1 %v1449_v19  ;;  %v1836_v16 = vld [vmem:[%s2546_s15] ss:$0 sm:$0xff] }
 0x7dd   : > { %1456 = vadd.xlane.f32.xlu1 %v1455_v20 }
 0x862   : > { %v1448_v39 = vpop.xlane.xlu0 %1447 }
 0x863   : > { %v1458_v40 = vmul.f32 0.03125, %v1448_v39 }
 0x865   : > { %v1462_v41 = vadd.f32 1e-05, %v1458_v40 }
 0x866   : > { %v1451_v42 = vpop.xlane.xlu1 %1450  ;;  %v1454_v43 = vpop.xlane.xlu0 %1453 }
 0x867   : > { %2005 = vrsqrt.f32 %v1462_v41  ;;  %v1459_v44 = vmul.f32 0.03125, %v1451_v42  ;;  %v1460_v45 = vmul.f32 0.03125, %v1454_v43 }
 0x869   : > { %v1463_v46 = vadd.f32 1e-05, %v1459_v44  ;;  %v1464_v47 = vadd.f32 1e-05, %v1460_v45 }
 0x86a   : > { %v1457_v48 = vpop.xlane.xlu1 %1456 }
 0x86b   : > { %2007 = vrsqrt.f32 %v1463_v46  ;;  %v1461_v49 = vmul.f32 0.03125, %v1457_v48 }
 0x86c   : > { %2009 = vrsqrt.f32 %v1464_v47 }
 0x86d   : > { %v1465_v50 = vadd.f32 1e-05, %v1461_v49 }
 0x86f   : > { %2011 = vrsqrt.f32 %v1465_v50 }
 0x871   : > { %v2006_v51 = vpop.eup %2005 }
 0x872   : > { %v1470_v53 = vmul.f32 %v2006_v51, %v1438_v28 }
 0x874   : > { %v1480_v54 = vmul.f32 %v1834_v52, %v1470_v53 }
 0x875   : > { %v2008_v55 = vpop.eup %2007 }
 0x876   : > { %v2010_v57 = vpop.eup %2009  ;;  %v1471_v58 = vmul.f32 %v2008_v55, %v1439_v38  ;;  %v1490_v60 = vadd.f32 %v1835_v56, %v1480_v54 }
 0x877   : > { %v1472_v59 = vmul.f32 %v2010_v57, %v1440_v29 }
 0x878   : > { %v1481_v61 = vmul.f32 %v1834_v52, %v1471_v58  ;;  %v1494_v2 = vsel %vm946_vm2, %v1490_v60, 0.0 }
 0x879   : > { %v2012_v62 = vpop.eup %2011  ;;  %v1482_v63 = vmul.f32 %v1834_v52, %v1472_v59 }
 0x87a   : > { %v1491_v0 = vadd.f32 %v1835_v56, %v1481_v61  ;;  %v1473_v1 = vmul.f32 %v2012_v62, %v1441_v14 }
 0x87b   : > { %v1492_v4 = vadd.f32 %v1835_v56, %v1482_v63 }
 0x87c   : > { %v1495_v3 = vsel %vm946_vm2, %v1491_v0, 0.0  ;;  %v1483_v5 = vmul.f32 %v1834_v52, %v1473_v1 }
 0x87d   : > { %v1496_v6 = vadd.f32 %v1495_v3, %v1494_v2  ;;  %v1503_v8 = vsel %vm946_vm2, %v1492_v4, 0.0 }
 0x87e   : > { %v1493_v7 = vadd.f32 %v1835_v56, %v1483_v5 }
 0x87f   : > { %v1497_v24 = vrot.slane %v1496_v6, 4 }
 0x880   : > { %v1504_v9 = vsel %vm946_vm2, %v1493_v7, 0.0 }
 0x881   : > { %v1498_v34 = vadd.f32 %v1497_v24, %v1496_v6  ;;  %v1505_v10 = vadd.f32 %v1504_v9, %v1503_v8 }
 0x883   : > { %v1499_v11 = vrot.slane %v1498_v34, 2  ;;  %v1506_v37 = vrot.slane %v1505_v10, 4 }
 0x885   : > { %v1500_v35 = vadd.f32 %v1499_v11, %v1498_v34  ;;  %v1507_v12 = vadd.f32 %v1506_v37, %v1505_v10 }
 0x887   : > { %v1501_v13 = vrot.slane %v1500_v35, 1  ;;  %v1508_v26 = vrot.slane %v1507_v12, 2 }
 0x889   : > { %v1502_v27 = vadd.f32 %v1501_v13, %v1500_v35  ;;  %v1509_v28 = vadd.f32 %v1508_v26, %v1507_v12 }
 0x88b   : > { %v1510_v29 = vrot.slane %v1509_v28, 1  ;;  %v1513_v30 = vmul.f32 0.0625, %v1502_v27 }
 0x88d   : > { %v1511_v31 = vadd.f32 %v1510_v29, %v1509_v28  ;;  %v1515_v33 = vpack.c.bf16 %v1513_v30, %v1513_v30 }
 0x88f   : > { %v1514_v32 = vmul.f32 0.0625, %v1511_v31  ;;  %v1530_v36 = vunpack.c.l.b16 %v1515_v33 }
 0x891   : > { %v1516_v25 = vpack.c.bf16 %v1514_v32, %v1514_v32 }
 0x893   : > { %v1531_v38 = vunpack.c.l.b16 %v1516_v25 }
 0x895   : > { %v1533_v14 = vsel %vm1532_vm7, %v1531_v38, %v1530_v36 }
 0x896   : > { %v1534_v15 = vpack.c.b16 %v1533_v14, %v1533_v14 }
 0x898   : > { %1919 = vmatmul.mubr.msk.bf16.vlgmr.msra.gmra.mrb[0].mxu0 %vm946_vm2, %v1534_v15 }
 0x96b   : > { %v1584_v17 = vpop.f32.mrb[0].mxu0 }
 0x96c   : > { %v1585_v18 = vadd.f32 %v1836_v16, %v1584_v17  ;;  %v1920_v19 = vpop.f32.mrb[1].mxu0 }
 0x96d   : > { %v1587_v20 = vpop.f32.mrb[2].mxu0 }
 0x96e   : > { %1590 = vst [vmem:[#allocation3] sm:$0x3] %v1585_v18  ;;  %v1921_v21 = vpop.f32.mrb[3].mxu0 }
 0x96f PF: > { %s2547_s24 = sld [smem:[#allocation7_spill]]  ;;  %s2080_s23 = smov [#allocation3]  }
 0x970   : > { %s1600_s2 = sshll.u32 %s2080_s23, 4  ;;  %s1601_s2 = int_to_ptr.vmem [resolvable:$true] %s1600_s2 }
 0x971   : > { %s2013_s7 = scalar_lea.vmem %s1601_s2, 32  ;;  %p2020_p12 = scmp.lt.s32.totalorder %s1601_s2, %s1601_s2 }
 0x972   : > { %p2014_p9 = scmp.ne.s32.totalorder %s1601_s2, %s2013_s7  ;;  %p2021_p13 = scmp.lt.s32.totalorder %s2013_s7, %s2013_s7 }
 0x974   : > { %p2022_p0 = por %p2021_p13, %p2020_p12 }
 0x975   : > { %s2548_s26 = sadd.s32 4294967295, %s2547_s24  }
 0x976   : > { %p2456_p8 = scmp.eq.s32.totalorder %s2548_s26, 1 }
 0x978   : > { %p2015_p10 = pnand %p2014_p9, %p2456_p8 }
 0x97a   : > { %p2016_p11 = pneg %p2015_p10 }
 0x97c   : > { %p2023_p1 = pnand %p2022_p0, %p2016_p11 }
 0x97e   : > { %2026 = shalt.err (!%p2023_p1)
}
 0x97f   : > { %s2550_s8 = sld [smem:[#allocation20_spill]] }
 0x985   : > { %s2027_s0 = scalar_lea.hbm %s2550_s8, 32 }
 0x986   : > { %p2028_p2 = scmp.ne.s32.totalorder %s2550_s8, %s2027_s0  ;;  %p2033_p5 = scmp.lt.u32.totalorder %s2027_s0, %s2550_s8 }
 0x988   : > { %p2029_p3 = pnand %p2028_p2, %p2456_p8 }
 0x98a   : > { %p2030_p4 = pneg %p2029_p3 }
 0x98c   : > { %p2035_p6 = pnand %p2033_p5, %p2030_p4 }
 0x98e   : > { %2038 = shalt.err (!%p2035_p6)
}
 0x98f   : > { %1923 = dma.vmem_to_hbm [thread:$0]  (%p2456_p8), %s1601_s2, 32, %s2550_s8, [#allocation4]  }
 0x990   : > { %2056 = dma.done.wait (%p2456_p8), [#allocation4], 32  }
 0x991   : > { %2058 = vsyncadd (%p2456_p8), [#allocation4], 4294967264 }
 0x992 PF: > { %s2551_s5 = sld [smem:[#allocation7_spill]]  ;;  %s2552_s0 = sld [smem:[#allocation6_spill]] }
 0x993   : > { %s2553_s30 = sld [smem:[#allocation8_spill]] }
 0x998   : > { %s30_s20 = sadd.s32 1, %s2551_s5  }
 0x999   : > { %p27_p7 = scmp.ge.s32.totalorder %s30_s20, 4  }
 0x99b   :  { %29 = sbr.rel (!%p27_p7) target bundleno = 15 (0xf), region = 187 }
 0x9a2   :  { %1613 = vsyncpa [#allocation4], 1 }
 0x9a3   :  { %1615 = vsyncpa [#allocation4 + $0x1], 1 }

</bundles_post_ra>
